<compile_context>
chip_gen: v7x
topology: tpu7x:2x2x1
jax: 0.10.0
libtpu: 0.0.40
codegen_flags: <defaults>
</compile_context>

<pallas_src>
import functools

import jax
import jax.numpy as jnp
from jax.experimental import pallas as pl
from jax.experimental.pallas import tpu as pltpu

KSIZE = 9
STRIDE = 2
NUM_ROUTING_ITERS = 3

KTILE = 256   # contraction tile: multiple of 256 (v6e/v7x MXU depth; 2x128 on v5e)
GTILE = 128   # minimum routing-group (lane) tile


def _round_up(x, m):
    return ((x + m - 1) // m) * m


# ---------------------------------------------------------------------------
# Fused kernel: conv matmul (bf16 in / f32 acc) + bias + dynamic routing.
#   w_ref    : (NC*OC, KTILE)      bf16   weight K-slice
#   p_ref    : (1, KTILE, OW*TG)   bf16   im2col patches K-slice, lanes = (ow, g)
#   bias_ref : (NC*OC, 1)          f32
#   v_ref    : (NC, OW, 1, TG)     f32    routed output v_j
#   acc_ref  : (NC*OC, OW*TG)      f32    VMEM u_hat accumulator (scratch)
# grid = (G tiles [parallel], K tiles [arbitrary / reduction, last])
# ---------------------------------------------------------------------------
def _make_fused_kernel(nc, oc, ow, tg, n_iters):
    inv_nc = 1.0 / nc

    def kernel(w_ref, p_ref, bias_ref, v_ref, acc_ref):
        k = pl.program_id(1)

        @pl.when(k == 0)
        def _init():
            acc_ref[...] = jnp.zeros_like(acc_ref)

        # conv-as-matmul: ONE lane-dense (NC*OC, OW*TG) MXU tile per K slice.
        acc_ref[...] += jnp.dot(w_ref[...], p_ref[0],
                                preferred_element_type=jnp.float32)

        @pl.when(k == pl.num_programs(1) - 1)
        def _routing():
            bias = bias_ref[...]                                  # (NC*OC, 1) f32
            # u_hat tile as (NC, OW, OC, TG), assembled from static 128-aligned lane
            # slices and OC-row sublane slices (no in-kernel reshape/transpose).
            # All routing math stays f32.
            u = jnp.stack(
                [jnp.stack([acc_ref[i * oc:(i + 1) * oc,
                                    owi * tg:(owi + 1) * tg]
                            for owi in range(ow)], axis=0)
                 + bias[None, i * oc:(i + 1) * oc, :]
                 for i in range(nc)], axis=0)

            def squash(s):
                # s: (NC, OW, 1, TG); norm over OW (torch dim=-1 of u_hat_stack)
                sn2 = jnp.sum(s * s, axis=1, keepdims=True)       # (NC, 1, 1, TG)
                return jnp.sqrt(sn2) * pl.reciprocal(1.0 + sn2, approx=True) * s

            # iteration 0: b_ij == 0  =>  softmax over NC is the constant 1/NC
            s = jnp.sum(u, axis=2, keepdims=True) * inv_nc        # (NC, OW, 1, TG)
            v = squash(s)
            b = jnp.sum(u * v, axis=1, keepdims=True)             # (NC, 1, OC, TG)

            for it in range(1, n_iters):
                e = jnp.exp(b - jnp.max(b, axis=0, keepdims=True))
                c = e * pl.reciprocal(jnp.sum(e, axis=0, keepdims=True),
                                      approx=True)                # (NC, 1, OC, TG)
                s = jnp.sum(c * u, axis=2, keepdims=True)         # (NC, OW, 1, TG)
                v = squash(s)
                if it < n_iters - 1:
                    b = b + jnp.sum(u * v, axis=1, keepdims=True)

            v_ref[...] = v

    return kernel


# ---------------------------------------------------------------------------
# Wrapper: layout / padding glue in plain JAX, heavy lifting in the fused kernel.
# ---------------------------------------------------------------------------
def capsule_layer_forward(x, weight, bias, num_capsules, out_channels):
    """x: (B, IC, H, W) f32; weight: (NC*OC, IC, K, K); bias: (NC*OC,).
    Returns the PyTorch module's output: (B, NC, 1, OH, OW) (.squeeze(-1) if OW==1)."""
    B, IC, H, W = x.shape
    OH = (H - KSIZE) // STRIDE + 1
    OW = (W - KSIZE) // STRIDE + 1
    NC, OC = num_capsules, out_channels
    NCOC = NC * OC
    Kdim = IC * KSIZE * KSIZE
    Kpad = _round_up(Kdim, KTILE)
    G = B * OH                                  # routing groups (b, oh) -> lanes
    Gpad = _round_up(G, GTILE)
    TG = 512 if Gpad % 512 == 0 else (256 if Gpad % 256 == 0 else GTILE)
    NGT = Gpad // TG

    # im2col via XLA patch extraction; feature order (ic, kh, kw) matches the
    # (NC*OC, IC*K*K) weight flatten.  Cast to bf16 for the MXU.
    # TODO(synk): gather the 9x9/stride-2 patches in-kernel with strided pl.ds loads
    # from a VMEM-resident x tile to avoid the K*K patch expansion through HBM.
    patches = jax.lax.conv_general_dilated_patches(
        x.astype(jnp.bfloat16), filter_shape=(KSIZE, KSIZE),
        window_strides=(STRIDE, STRIDE), padding="VALID",
        dimension_numbers=("NCHW", "OIHW", "NCHW"))          # (B, IC*K*K, OH, OW)
    # (Kdim, OW, G) with routing-group index g = b*OH + oh, then fold the OW axis
    # into the per-g-tile lane axis: (NGT, Kpad, OW*TG).
    p = patches.transpose(1, 3, 0, 2).reshape(Kdim, OW, G)
    p = jnp.pad(p, ((0, Kpad - Kdim), (0, 0), (0, Gpad - G)))
    p = (p.reshape(Kpad, OW, NGT, TG)
          .transpose(2, 0, 1, 3)
          .reshape(NGT, Kpad, OW * TG))

    wmat = jnp.pad(weight.reshape(NCOC, Kdim).astype(jnp.bfloat16),
                   ((0, 0), (0, Kpad - Kdim)))
    bias_col = bias.reshape(NCOC, 1).astype(jnp.float32)

    kernel = _make_fused_kernel(NC, OC, OW, TG, NUM_ROUTING_ITERS)
    v = pl.pallas_call(
        kernel,
        out_shape=jax.ShapeDtypeStruct((NC, OW, 1, Gpad), jnp.float32),
        grid_spec=pltpu.PrefetchScalarGridSpec(
            num_scalar_prefetch=0,
            grid=(NGT, Kpad // KTILE),
            in_specs=[
                pl.BlockSpec((NCOC, KTILE), lambda g, k: (0, k)),
                pl.BlockSpec((1, KTILE, OW * TG), lambda g, k: (g, k, 0)),
                pl.BlockSpec((NCOC, 1), lambda g, k: (0, 0)),
            ],
            out_specs=pl.BlockSpec((NC, OW, 1, TG), lambda g, k: (0, 0, 0, g)),
            scratch_shapes=[pltpu.VMEM((NCOC, OW * TG), jnp.float32)],
        ),
        compiler_params=pltpu.CompilerParams(
            dimension_semantics=("parallel", "arbitrary"),
            vmem_limit_bytes=32 * 1024 * 1024,
        ),
    )(wmat, p, bias_col)

    v = v[:, :, :, :G]                                           # drop lane padding
    out = v.reshape(NC, OW, 1, B, OH).transpose(3, 0, 2, 4, 1)   # (B, NC, 1, OH, OW)
    if out.shape[-1] == 1:                                       # torch .squeeze(-1)
        out = out.reshape(out.shape[:-1])
    return out


# ---------------------------------------------------------------------------
# Pure-JAX reference mirroring the PyTorch module (for validation)
# ---------------------------------------------------------------------------
def reference_forward(x, weight, bias, num_capsules, out_channels):
    out = jax.lax.conv_general_dilated(
        x, weight, (STRIDE, STRIDE), "VALID",
        dimension_numbers=("NCHW", "OIHW", "NCHW"))
    out = out + bias[None, :, None, None]
    B = x.shape[0]
    OH, OW = out.shape[2], out.shape[3]
    u = out.reshape(B, num_capsules, out_channels, OH, OW)       # u_hat_stack
    b_ij = jnp.zeros((B, num_capsules, out_channels, 1), jnp.float32)
    v_j = None
    for it in range(NUM_ROUTING_ITERS):
        c_ij = jax.nn.softmax(b_ij, axis=1)
        s_j = jnp.sum(c_ij * u, axis=2, keepdims=True)
        s_norm = jnp.sqrt(jnp.sum(s_j * s_j, axis=-1, keepdims=True))
        v_j = s_norm / (1.0 + s_norm * s_norm) * s_j
        if it < NUM_ROUTING_ITERS - 1:
            b_ij = b_ij + jnp.sum(u * v_j, axis=-1, keepdims=True)
    res = v_j
    if res.shape[-1] == 1:
        res = res.reshape(res.shape[:-1])
    return res


if __name__ == "__main__":
    # The PyTorch module's dynamic_routing only broadcasts legally when
    # B == num_capsules == out_channels == OH; these shapes respect that.
    B, IC, H, W = 4, 4, 16, 16
    NUM_CAPSULES, OUT_CHANNELS = 4, 4

    key = jax.random.PRNGKey(0)
    kx, kw, kb = jax.random.split(key, 3)
    x = jax.random.normal(kx, (B, IC, H, W), jnp.float32)
    weight = jax.random.normal(
        kw, (NUM_CAPSULES * OUT_CHANNELS, IC, KSIZE, KSIZE), jnp.float32) * 0.05
    bias = jax.random.normal(kb, (NUM_CAPSULES * OUT_CHANNELS,), jnp.float32) * 0.05

    fwd = jax.jit(functools.partial(capsule_layer_forward,
                                    num_capsules=NUM_CAPSULES,
                                    out_channels=OUT_CHANNELS))
    out = fwd(x, weight, bias)
    jax.block_until_ready(out)

    # Reference fed the same bf16-quantized x / weight the MXU path sees (bias add,
    # accumulation and routing are f32 in both), isolating kernel correctness.
    x_q = x.astype(jnp.bfloat16).astype(jnp.float32)
    w_q = weight.astype(jnp.bfloat16).astype(jnp.float32)
    ref = reference_forward(x_q, w_q, bias, NUM_CAPSULES, OUT_CHANNELS)
    jax.block_until_ready(ref)

    OH = (H - KSIZE) // STRIDE + 1
    OW = (W - KSIZE) // STRIDE + 1
    assert out.shape == (B, NUM_CAPSULES, 1, OH, OW), out.shape
    assert jnp.allclose(out, ref, atol=3e-3, rtol=1e-2), (
        "max abs err %e" % float(jnp.max(jnp.abs(out - ref))))

    print("KERNEL_OK")
</pallas_src>

<mosaic_0001>
module attributes {stable_mosaic.version = 11 : i64} {
  func.func @kernel(%arg0: i32, %arg1: i32, %arg2: memref<16x256xbf16, #tpu.memory_space<vmem>>, %arg3: memref<1x256x512xbf16, #tpu.memory_space<vmem>>, %arg4: memref<16x1xf32, #tpu.memory_space<vmem>>, %arg5: memref<4x4x1x128xf32, #tpu.memory_space<vmem>>, %arg6: memref<16x512xf32, #tpu.memory_space<vmem>>) attributes {dimension_semantics = [#tpu.dimension_semantics<parallel>, #tpu.dimension_semantics<arbitrary>], iteration_bounds = array<i64: 1, 2>, scalar_prefetch = 0 : i64, scratch_operands = 1 : i64, tpu.core_type = #tpu.core_type<tc>, window_params = [{transform_indices = @transform_0, window_bounds = array<i64: 16, 256>}, {transform_indices = @transform_1, window_bounds = array<i64: 1, 256, 512>}, {pipeline_mode = #tpu.pipeline_mode<synchronous>, transform_indices = @transform_2, window_bounds = array<i64: 16, 1>}, {transform_indices = @transform_3, window_bounds = array<i64: 4, 4, 1, 128>}]} {
    %c0_i32 = arith.constant 0 : i32
    %0 = arith.cmpi eq, %arg1, %c0_i32 : i32
    %1 = arith.extui %0 : i1 to i32
    %c0_i32_0 = arith.constant 0 : i32
    %2 = arith.cmpi ne, %1, %c0_i32_0 : i32
    scf.if %2 {
      %cst_10 = arith.constant 0.000000e+00 : f32
      %13 = vector.broadcast %cst_10 : f32 to vector<16x512xf32>
      %c0_11 = arith.constant 0 : index
      %c0_12 = arith.constant 0 : index
      %14 = vector.load %arg6[%c0_11, %c0_12] : memref<16x512xf32, #tpu.memory_space<vmem>>, vector<16x512xf32>
      tpu.vector_store %arg6[%c0_11, %c0_12], %13 {strides = array<i32>} : memref<16x512xf32, #tpu.memory_space<vmem>>, vector<16x512xf32>,
    } else {
    }
    %c0 = arith.constant 0 : index
    %c0_1 = arith.constant 0 : index
    %3 = vector.load %arg6[%c0, %c0_1] : memref<16x512xf32, #tpu.memory_space<vmem>>, vector<16x512xf32>
    %c0_2 = arith.constant 0 : index
    %c0_3 = arith.constant 0 : index
    %4 = vector.load %arg2[%c0_2, %c0_3] : memref<16x256xbf16, #tpu.memory_space<vmem>>, vector<16x256xbf16>
    %c0_4 = arith.constant 0 : index
    %c0_5 = arith.constant 0 : index
    %c0_6 = arith.constant 0 : index
    %5 = vector.load %arg3[%c0_4, %c0_5, %c0_6] : memref<1x256x512xbf16, #tpu.memory_space<vmem>>, vector<1x256x512xbf16>
    %6 = vector.shape_cast %5 : vector<1x256x512xbf16> to vector<256x512xbf16>
    %cst = arith.constant dense<0.000000e+00> : vector<16x512xf32>
    %7 = tpu.matmul %4, %6, %cst {dimension_numbers = #tpu.dot_dimension_numbers<[1], [0], [0], [1], [0, 0, 1, 1], [], []>} : vector<16x256xbf16>, vector<256x512xbf16>, vector<16x512xf32> -> vector<16x512xf32>
    %8 = arith.addf %3, %7 : vector<16x512xf32>
    %c0_7 = arith.constant 0 : index
    %c0_8 = arith.constant 0 : index
    %9 = vector.load %arg6[%c0_7, %c0_8] : memref<16x512xf32, #tpu.memory_space<vmem>>, vector<16x512xf32>
    tpu.vector_store %arg6[%c0_7, %c0_8], %8 {strides = array<i32>} : memref<16x512xf32, #tpu.memory_space<vmem>>, vector<16x512xf32>,
    %c1_i32 = arith.constant 1 : i32
    %10 = arith.cmpi eq, %arg1, %c1_i32 : i32
    %11 = arith.extui %10 : i1 to i32
    %c0_i32_9 = arith.constant 0 : i32
    %12 = arith.cmpi ne, %11, %c0_i32_9 : i32
    scf.if %12 {
      %c0_10 = arith.constant 0 : index
      %c0_11 = arith.constant 0 : index
      %13 = vector.load %arg4[%c0_10, %c0_11] : memref<16x1xf32, #tpu.memory_space<vmem>>, vector<16x1xf32>
      %c0_12 = arith.constant 0 : index
      %c0_13 = arith.constant 0 : index
      %14 = vector.load %arg6[%c0_12, %c0_13] : memref<16x512xf32, #tpu.memory_space<vmem>>, vector<4x128xf32>
      %c0_14 = arith.constant 0 : index
      %c128 = arith.constant 128 : index
      %15 = vector.load %arg6[%c0_14, %c128] : memref<16x512xf32, #tpu.memory_space<vmem>>, vector<4x128xf32>
      %c0_15 = arith.constant 0 : index
      %c256 = arith.constant 256 : index
      %16 = vector.load %arg6[%c0_15, %c256] : memref<16x512xf32, #tpu.memory_space<vmem>>, vector<4x128xf32>
      %c0_16 = arith.constant 0 : index
      %c384 = arith.constant 384 : index
      %17 = vector.load %arg6[%c0_16, %c384] : memref<16x512xf32, #tpu.memory_space<vmem>>, vector<4x128xf32>
      %18 = vector.shape_cast %14 : vector<4x128xf32> to vector<1x4x128xf32>
      %19 = vector.shape_cast %15 : vector<4x128xf32> to vector<1x4x128xf32>
      %20 = vector.shape_cast %16 : vector<4x128xf32> to vector<1x4x128xf32>
      %21 = vector.shape_cast %17 : vector<4x128xf32> to vector<1x4x128xf32>
      %22 = tpu.concatenate %18, %19, %20, %21 in 0 : vector<1x4x128xf32>, vector<1x4x128xf32>, vector<1x4x128xf32>, vector<1x4x128xf32> -> vector<4x4x128xf32>
      %23 = vector.extract_strided_slice %13 {offsets = [0, 0], sizes = [4, 1], strides = [1, 1]} : vector<16x1xf32> to vector<4x1xf32>
      %24 = vector.shape_cast %23 : vector<4x1xf32> to vector<1x4x1xf32>
      %25 = vector.broadcast %24 : vector<1x4x1xf32> to vector<4x4x128xf32>
      %26 = arith.addf %22, %25 : vector<4x4x128xf32>
      %c4 = arith.constant 4 : index
      %c0_17 = arith.constant 0 : index
      %27 = vector.load %arg6[%c4, %c0_17] : memref<16x512xf32, #tpu.memory_space<vmem>>, vector<4x128xf32>
      %c4_18 = arith.constant 4 : index
      %c128_19 = arith.constant 128 : index
      %28 = vector.load %arg6[%c4_18, %c128_19] : memref<16x512xf32, #tpu.memory_space<vmem>>, vector<4x128xf32>
      %c4_20 = arith.constant 4 : index
      %c256_21 = arith.constant 256 : index
      %29 = vector.load %arg6[%c4_20, %c256_21] : memref<16x512xf32, #tpu.memory_space<vmem>>, vector<4x128xf32>
      %c4_22 = arith.constant 4 : index
      %c384_23 = arith.constant 384 : index
      %30 = vector.load %arg6[%c4_22, %c384_23] : memref<16x512xf32, #tpu.memory_space<vmem>>, vector<4x128xf32>
      %31 = vector.shape_cast %27 : vector<4x128xf32> to vector<1x4x128xf32>
      %32 = vector.shape_cast %28 : vector<4x128xf32> to vector<1x4x128xf32>
      %33 = vector.shape_cast %29 : vector<4x128xf32> to vector<1x4x128xf32>
      %34 = vector.shape_cast %30 : vector<4x128xf32> to vector<1x4x128xf32>
      %35 = tpu.concatenate %31, %32, %33, %34 in 0 : vector<1x4x128xf32>, vector<1x4x128xf32>, vector<1x4x128xf32>, vector<1x4x128xf32> -> vector<4x4x128xf32>
      %36 = vector.extract_strided_slice %13 {offsets = [4, 0], sizes = [4, 1], strides = [1, 1]} : vector<16x1xf32> to vector<4x1xf32>
      %37 = vector.shape_cast %36 : vector<4x1xf32> to vector<1x4x1xf32>
      %38 = vector.broadcast %37 : vector<1x4x1xf32> to vector<4x4x128xf32>
      %39 = arith.addf %35, %38 : vector<4x4x128xf32>
      %c8 = arith.constant 8 : index
      %c0_24 = arith.constant 0 : index
      %40 = vector.load %arg6[%c8, %c0_24] : memref<16x512xf32, #tpu.memory_space<vmem>>, vector<4x128xf32>
      %c8_25 = arith.constant 8 : index
      %c128_26 = arith.constant 128 : index
      %41 = vector.load %arg6[%c8_25, %c128_26] : memref<16x512xf32, #tpu.memory_space<vmem>>, vector<4x128xf32>
      %c8_27 = arith.constant 8 : index
      %c256_28 = arith.constant 256 : index
      %42 = vector.load %arg6[%c8_27, %c256_28] : memref<16x512xf32, #tpu.memory_space<vmem>>, vector<4x128xf32>
      %c8_29 = arith.constant 8 : index
      %c384_30 = arith.constant 384 : index
      %43 = vector.load %arg6[%c8_29, %c384_30] : memref<16x512xf32, #tpu.memory_space<vmem>>, vector<4x128xf32>
      %44 = vector.shape_cast %40 : vector<4x128xf32> to vector<1x4x128xf32>
      %45 = vector.shape_cast %41 : vector<4x128xf32> to vector<1x4x128xf32>
      %46 = vector.shape_cast %42 : vector<4x128xf32> to vector<1x4x128xf32>
      %47 = vector.shape_cast %43 : vector<4x128xf32> to vector<1x4x128xf32>
      %48 = tpu.concatenate %44, %45, %46, %47 in 0 : vector<1x4x128xf32>, vector<1x4x128xf32>, vector<1x4x128xf32>, vector<1x4x128xf32> -> vector<4x4x128xf32>
      %49 = vector.extract_strided_slice %13 {offsets = [8, 0], sizes = [4, 1], strides = [1, 1]} : vector<16x1xf32> to vector<4x1xf32>
      %50 = vector.shape_cast %49 : vector<4x1xf32> to vector<1x4x1xf32>
      %51 = vector.broadcast %50 : vector<1x4x1xf32> to vector<4x4x128xf32>
      %52 = arith.addf %48, %51 : vector<4x4x128xf32>
      %c12 = arith.constant 12 : index
      %c0_31 = arith.constant 0 : index
      %53 = vector.load %arg6[%c12, %c0_31] : memref<16x512xf32, #tpu.memory_space<vmem>>, vector<4x128xf32>
      %c12_32 = arith.constant 12 : index
      %c128_33 = arith.constant 128 : index
      %54 = vector.load %arg6[%c12_32, %c128_33] : memref<16x512xf32, #tpu.memory_space<vmem>>, vector<4x128xf32>
      %c12_34 = arith.constant 12 : index
      %c256_35 = arith.constant 256 : index
      %55 = vector.load %arg6[%c12_34, %c256_35] : memref<16x512xf32, #tpu.memory_space<vmem>>, vector<4x128xf32>
      %c12_36 = arith.constant 12 : index
      %c384_37 = arith.constant 384 : index
      %56 = vector.load %arg6[%c12_36, %c384_37] : memref<16x512xf32, #tpu.memory_space<vmem>>, vector<4x128xf32>
      %57 = vector.shape_cast %53 : vector<4x128xf32> to vector<1x4x128xf32>
      %58 = vector.shape_cast %54 : vector<4x128xf32> to vector<1x4x128xf32>
      %59 = vector.shape_cast %55 : vector<4x128xf32> to vector<1x4x128xf32>
      %60 = vector.shape_cast %56 : vector<4x128xf32> to vector<1x4x128xf32>
      %61 = tpu.concatenate %57, %58, %59, %60 in 0 : vector<1x4x128xf32>, vector<1x4x128xf32>, vector<1x4x128xf32>, vector<1x4x128xf32> -> vector<4x4x128xf32>
      %62 = vector.extract_strided_slice %13 {offsets = [12, 0], sizes = [4, 1], strides = [1, 1]} : vector<16x1xf32> to vector<4x1xf32>
      %63 = vector.shape_cast %62 : vector<4x1xf32> to vector<1x4x1xf32>
      %64 = vector.broadcast %63 : vector<1x4x1xf32> to vector<4x4x128xf32>
      %65 = arith.addf %61, %64 : vector<4x4x128xf32>
      %66 = vector.shape_cast %26 : vector<4x4x128xf32> to vector<1x4x4x128xf32>
      %67 = vector.shape_cast %39 : vector<4x4x128xf32> to vector<1x4x4x128xf32>
      %68 = vector.shape_cast %52 : vector<4x4x128xf32> to vector<1x4x4x128xf32>
      %69 = vector.shape_cast %65 : vector<4x4x128xf32> to vector<1x4x4x128xf32>
      %70 = tpu.concatenate %66, %67, %68, %69 in 0 : vector<1x4x4x128xf32>, vector<1x4x4x128xf32>, vector<1x4x4x128xf32>, vector<1x4x4x128xf32> -> vector<4x4x4x128xf32>
      %cst_38 = arith.constant dense<0.000000e+00> : vector<4x4x128xf32>
      %71 = vector.multi_reduction <add>, %70, %cst_38 [2] : vector<4x4x4x128xf32> to vector<4x4x128xf32>
      %72 = vector.shape_cast %71 : vector<4x4x128xf32> to vector<4x4x1x128xf32>
      %cst_39 = arith.constant 2.500000e-01 : f32
      %73 = vector.broadcast %cst_39 : f32 to vector<4x4x1x128xf32>
      %74 = arith.mulf %72, %73 : vector<4x4x1x128xf32>
      %75 = arith.mulf %74, %74 : vector<4x4x1x128xf32>
      %cst_40 = arith.constant dense<0.000000e+00> : vector<4x1x128xf32>
      %76 = vector.multi_reduction <add>, %75, %cst_40 [1] : vector<4x4x1x128xf32> to vector<4x1x128xf32>
      %77 = vector.shape_cast %76 : vector<4x1x128xf32> to vector<4x1x1x128xf32>
      %78 = math.sqrt %77 : vector<4x1x1x128xf32>
      %cst_41 = arith.constant 1.000000e+00 : f32
      %79 = vector.broadcast %cst_41 : f32 to vector<4x1x1x128xf32>
      %80 = arith.addf %79, %77 : vector<4x1x1x128xf32>
      %81 = tpu.reciprocal %80 {approx = true} : vector<4x1x1x128xf32> -> vector<4x1x1x128xf32>
      %82 = arith.mulf %78, %81 : vector<4x1x1x128xf32>
      %83 = vector.broadcast %82 : vector<4x1x1x128xf32> to vector<4x4x1x128xf32>
      %84 = arith.mulf %83, %74 : vector<4x4x1x128xf32>
      %85 = vector.broadcast %84 : vector<4x4x1x128xf32> to vector<4x4x4x128xf32>
      %86 = arith.mulf %70, %85 : vector<4x4x4x128xf32>
      %cst_42 = arith.constant dense<0.000000e+00> : vector<4x4x128xf32>
      %87 = vector.multi_reduction <add>, %86, %cst_42 [1] : vector<4x4x4x128xf32> to vector<4x4x128xf32>
      %88 = vector.shape_cast %87 : vector<4x4x128xf32> to vector<4x1x4x128xf32>
      %cst_43 = arith.constant dense<0xFF800000> : vector<1x4x128xf32>
      %89 = vector.multi_reduction <maximumf>, %88, %cst_43 [0] : vector<4x1x4x128xf32> to vector<1x4x128xf32>
      %90 = vector.shape_cast %89 : vector<1x4x128xf32> to vector<1x1x4x128xf32>
      %91 = vector.broadcast %90 : vector<1x1x4x128xf32> to vector<4x1x4x128xf32>
      %92 = arith.subf %88, %91 : vector<4x1x4x128xf32>
      %93 = math.exp %92 : vector<4x1x4x128xf32>
      %cst_44 = arith.constant dense<0.000000e+00> : vector<1x4x128xf32>
      %94 = vector.multi_reduction <add>, %93, %cst_44 [0] : vector<4x1x4x128xf32> to vector<1x4x128xf32>
      %95 = vector.shape_cast %94 : vector<1x4x128xf32> to vector<1x1x4x128xf32>
      %96 = tpu.reciprocal %95 {approx = true} : vector<1x1x4x128xf32> -> vector<1x1x4x128xf32>
      %97 = vector.broadcast %96 : vector<1x1x4x128xf32> to vector<4x1x4x128xf32>
      %98 = arith.mulf %93, %97 : vector<4x1x4x128xf32>
      %99 = vector.broadcast %98 : vector<4x1x4x128xf32> to vector<4x4x4x128xf32>
      %100 = arith.mulf %99, %70 : vector<4x4x4x128xf32>
      %cst_45 = arith.constant dense<0.000000e+00> : vector<4x4x128xf32>
      %101 = vector.multi_reduction <add>, %100, %cst_45 [2] : vector<4x4x4x128xf32> to vector<4x4x128xf32>
      %102 = vector.shape_cast %101 : vector<4x4x128xf32> to vector<4x4x1x128xf32>
      %103 = arith.mulf %102, %102 : vector<4x4x1x128xf32>
      %cst_46 = arith.constant dense<0.000000e+00> : vector<4x1x128xf32>
      %104 = vector.multi_reduction <add>, %103, %cst_46 [1] : vector<4x4x1x128xf32> to vector<4x1x128xf32>
      %105 = vector.shape_cast %104 : vector<4x1x128xf32> to vector<4x1x1x128xf32>
      %106 = math.sqrt %105 : vector<4x1x1x128xf32>
      %cst_47 = arith.constant 1.000000e+00 : f32
      %107 = vector.broadcast %cst_47 : f32 to vector<4x1x1x128xf32>
      %108 = arith.addf %107, %105 : vector<4x1x1x128xf32>
      %109 = tpu.reciprocal %108 {approx = true} : vector<4x1x1x128xf32> -> vector<4x1x1x128xf32>
      %110 = arith.mulf %106, %109 : vector<4x1x1x128xf32>
      %111 = vector.broadcast %110 : vector<4x1x1x128xf32> to vector<4x4x1x128xf32>
      %112 = arith.mulf %111, %102 : vector<4x4x1x128xf32>
      %113 = vector.broadcast %112 : vector<4x4x1x128xf32> to vector<4x4x4x128xf32>
      %114 = arith.mulf %70, %113 : vector<4x4x4x128xf32>
      %cst_48 = arith.constant dense<0.000000e+00> : vector<4x4x128xf32>
      %115 = vector.multi_reduction <add>, %114, %cst_48 [1] : vector<4x4x4x128xf32> to vector<4x4x128xf32>
      %116 = vector.shape_cast %115 : vector<4x4x128xf32> to vector<4x1x4x128xf32>
      %117 = arith.addf %88, %116 : vector<4x1x4x128xf32>
      %cst_49 = arith.constant dense<0xFF800000> : vector<1x4x128xf32>
      %118 = vector.multi_reduction <maximumf>, %117, %cst_49 [0] : vector<4x1x4x128xf32> to vector<1x4x128xf32>
      %119 = vector.shape_cast %118 : vector<1x4x128xf32> to vector<1x1x4x128xf32>
      %120 = vector.broadcast %119 : vector<1x1x4x128xf32> to vector<4x1x4x128xf32>
      %121 = arith.subf %117, %120 : vector<4x1x4x128xf32>
      %122 = math.exp %121 : vector<4x1x4x128xf32>
      %cst_50 = arith.constant dense<0.000000e+00> : vector<1x4x128xf32>
      %123 = vector.multi_reduction <add>, %122, %cst_50 [0] : vector<4x1x4x128xf32> to vector<1x4x128xf32>
      %124 = vector.shape_cast %123 : vector<1x4x128xf32> to vector<1x1x4x128xf32>
      %125 = tpu.reciprocal %124 {approx = true} : vector<1x1x4x128xf32> -> vector<1x1x4x128xf32>
      %126 = vector.broadcast %125 : vector<1x1x4x128xf32> to vector<4x1x4x128xf32>
      %127 = arith.mulf %122, %126 : vector<4x1x4x128xf32>
      %128 = vector.broadcast %127 : vector<4x1x4x128xf32> to vector<4x4x4x128xf32>
      %129 = arith.mulf %128, %70 : vector<4x4x4x128xf32>
      %cst_51 = arith.constant dense<0.000000e+00> : vector<4x4x128xf32>
      %130 = vector.multi_reduction <add>, %129, %cst_51 [2] : vector<4x4x4x128xf32> to vector<4x4x128xf32>
      %131 = vector.shape_cast %130 : vector<4x4x128xf32> to vector<4x4x1x128xf32>
      %132 = arith.mulf %131, %131 : vector<4x4x1x128xf32>
      %cst_52 = arith.constant dense<0.000000e+00> : vector<4x1x128xf32>
      %133 = vector.multi_reduction <add>, %132, %cst_52 [1] : vector<4x4x1x128xf32> to vector<4x1x128xf32>
      %134 = vector.shape_cast %133 : vector<4x1x128xf32> to vector<4x1x1x128xf32>
      %135 = math.sqrt %134 : vector<4x1x1x128xf32>
      %cst_53 = arith.constant 1.000000e+00 : f32
      %136 = vector.broadcast %cst_53 : f32 to vector<4x1x1x128xf32>
      %137 = arith.addf %136, %134 : vector<4x1x1x128xf32>
      %138 = tpu.reciprocal %137 {approx = true} : vector<4x1x1x128xf32> -> vector<4x1x1x128xf32>
      %139 = arith.mulf %135, %138 : vector<4x1x1x128xf32>
      %140 = vector.broadcast %139 : vector<4x1x1x128xf32> to vector<4x4x1x128xf32>
      %141 = arith.mulf %140, %131 : vector<4x4x1x128xf32>
      %c0_54 = arith.constant 0 : index
      %c0_55 = arith.constant 0 : index
      %c0_56 = arith.constant 0 : index
      %c0_57 = arith.constant 0 : index
      %142 = vector.load %arg5[%c0_54, %c0_55, %c0_56, %c0_57] : memref<4x4x1x128xf32, #tpu.memory_space<vmem>>, vector<4x4x1x128xf32>
      tpu.vector_store %arg5[%c0_54, %c0_55, %c0_56, %c0_57], %141 {strides = array<i32>} : memref<4x4x1x128xf32, #tpu.memory_space<vmem>>, vector<4x4x1x128xf32>,
    } else {
    }
    return
  }
  func.func @transform_0(%arg0: i32, %arg1: i32) -> (i32, i32) {
    %c0_i32 = arith.constant 0 : i32
    %c0_i32_0 = arith.constant 0 : i32
    return %c0_i32, %arg1 : i32, i32
  }
  func.func @transform_1(%arg0: i32, %arg1: i32) -> (i32, i32, i32) {
    %c0_i32 = arith.constant 0 : i32
    %c0_i32_0 = arith.constant 0 : i32
    return %arg0, %arg1, %c0_i32 : i32, i32, i32
  }
  func.func @transform_2(%arg0: i32, %arg1: i32) -> (i32, i32) {
    %c0_i32 = arith.constant 0 : i32
    %c0_i32_0 = arith.constant 0 : i32
    %c0_i32_1 = arith.constant 0 : i32
    return %c0_i32, %c0_i32_0 : i32, i32
  }
  func.func @transform_3(%arg0: i32, %arg1: i32) -> (i32, i32, i32, i32) {
    %c0_i32 = arith.constant 0 : i32
    %c0_i32_0 = arith.constant 0 : i32
    %c0_i32_1 = arith.constant 0 : i32
    %c0_i32_2 = arith.constant 0 : i32
    return %c0_i32, %c0_i32_0, %c0_i32_1, %arg0 : i32, i32, i32, i32
  }
}

</mosaic_0001>

<bundles_post_ra>
// kernel: capsule_layer_forward.1
= control target key start
LH: loop header
LB: loop body
LE: loop exit
PB: predicated region body
PF: predicated region fallthrough
CT: control target
= control target key end

     0   :  { %s2091_s12 = smov 0   ;;  %s2093_s13 = smov 0   ;;  %s2783_s0 = inlined_call_operand.vmem [shape: bf16[16,512], index: 0, kind: input, shape index: {}]   ;;  %s2784_s1 = inlined_call_operand.vmem [shape: bf16[1,512,512], index: 1, kind: input, shape index: {}]   ;;  %s2785_s2 = inlined_call_operand.vmem [shape: f32[16,1], index: 2, kind: input, shape index: {}]   ;;  %s2786_s3 = inlined_call_operand.vmem [shape: f32[4,4,1,128], index: 3, kind: output, shape index: {}]  }
   0x1   :  { %s2095_s14 = smov 0   ;;  %s2097_s15 = smov 0  }
   0x2   :  { %s2099_s16 = smov 0  }
   0x3 LB: > { %s22_s17 = sadd.s32 1, %s2063_s15  ;;  %p39_p1 = scmp.ne.s32.totalorder %s2055_s13, %s2051_s12  ;;  %s2067_s16 = sphi %s2099_s16, %s13_s16   ;;  %s2063_s15 = sphi %s2097_s15, %s2799_s15   ;;  %s2059_s14 = sphi %s2095_s14, %s2798_s14   ;;  %s2055_s13 = sphi %s2093_s13, %s2797_s13   ;;  %s2051_s12 = sphi %s2091_s12, %s2796_s12  }
   0x4   : > { %p23_p0 = scmp.ge.s32.totalorder %s22_s17, 2  ;;  %p40_p2 = scmp.eq.s32.totalorder %s2067_s16, 0 }
   0x5   : > { %s32_s19 = sadd.s32 1, %s2055_s13  ;;  %p1737_p5 = scmp.ge.s32.totalorder %s2067_s16, 2 }
   0x6   : > { %s2801_s17 = smov (%p23_p0, %s22_s17), 0  ;;  %p41_p3 = por %p40_p2, %p39_p1 }
   0x7   : > { %s29_s18 = ssub.s32 %s2063_s15, %s2801_s17  ;;  %143 = sbr.rel (%p1737_p5) target bundleno = 21 (0x15), region = 20 }
   0x8   : > { %p30_p4 = scmp.eq.s32.totalorder %s29_s18, 0 }
   0xa   : > { %s2126_s20 = scalar_select %p30_p4, %s2055_s13, %s32_s19  }
   0xe   : > { %146 = sbr.rel (!%p41_p3) target bundleno = 21 (0x15), region = 24  ;;  %s148_s21 = sand.u32 (%p41_p3), 1, %s2055_s13  }
   0xf   : > { %s1817_s22 = sshll.u32 (%p41_p3), %s2063_s15, 3  ;;  %s1738_s23 = sshll.u32 (%p41_p3), %s148_s21, 4 }
  0x10   : > { %s153_s26 = scalar_lea.vmem (%p41_p3), %s2783_s0, %s1817_s22  ;;  %s150_s27 = scalar_lea.vmem (%p41_p3), [#allocation3], %s1738_s23 }
  0x11   : > { %v183_v0 = vld [vmem:[%s153_s26] sm:$0xff] (%p41_p3)  ;;  %v185_v1 = vld [vmem:[%s153_s26 + $0x10] sm:$0xff] (%p41_p3) }
  0x12   : > { %184 = vst [vmem:[%s150_s27] sm:$0xff] (%p41_p3), %v183_v0  ;;  %186 = vst [vmem:[%s150_s27 + $0x8] sm:$0xff] (%p41_p3), %v185_v1 }
  0x15 PF: > { %p1741_p6 = scmp.ge.s32.totalorder %s2067_s16, 1  ;;  %p205_p7 = scmp.lt.s32.totalorder %s2067_s16, 3 }
  0x17   : > { %p206_p8 = pnand %p1741_p6, %p205_p7 }
  0x18   : > { %s212_s28 = sand.u32 (!%p206_p8), 1, %s2051_s12   ;;  %s1743_s29 = sshll.u32 (!%p206_p8), %s2059_s14, 5 }
  0x19   : > { %209 = sbr.rel (%p206_p8) target bundleno = 762 (0x2fa), region = 66  ;;  %s2138_s30 = sshll.u32 (!%p206_p8), %s212_s28, 4 }
  0x1a   : > { %p247_p9 = scmp.lt.s32.totalorder (!%p206_p8), %s1743_s29, 63  ;;  %s214_s8 = scalar_lea.vmem (!%p206_p8), [#allocation3], %s2138_s30 }
  0x1b   : > { %p1746_p10 = scmp.ne.s32.totalorder (!%p206_p8), %s2059_s14, 0 }
  0x20   : > { %s2803_s29 = smov (!%p247_p9, %s1743_s29), 63  ;;  %261 = sbr.rel (%p1746_p10) target bundleno = 39 (0x27), region = 74 }
  0x21   : > { %s1818_s4 = sshll.u32 %s2803_s29, 4  ;;  %v2069_v2 = vmov (!%p1746_p10), 0.0  }
  0x22   : > { %s2143_s7 = scalar_lea.vmem %s2784_s1, %s1818_s4  ;;  %262 = vst [vmem:[#allocation2] sm:$0xff] (!%p1746_p10), %v2069_v2  ;;  %263 = vst [vmem:[#allocation2 + $0x8] sm:$0xff] (!%p1746_p10), %v2069_v2 }
  0x23   : > { %264 = vst [vmem:[#allocation2 + $0x10] sm:$0xff] (!%p1746_p10), %v2069_v2  ;;  %265 = vst [vmem:[#allocation2 + $0x18] sm:$0xff] (!%p1746_p10), %v2069_v2 }
  0x24   : > { %266 = vst [vmem:[#allocation2 + $0x20] sm:$0xff] (!%p1746_p10), %v2069_v2  ;;  %267 = vst [vmem:[#allocation2 + $0x28] sm:$0xff] (!%p1746_p10), %v2069_v2 }
  0x25   : > { %268 = vst [vmem:[#allocation2 + $0x30] sm:$0xff] (!%p1746_p10), %v2069_v2  ;;  %269 = vst [vmem:[#allocation2 + $0x38] sm:$0xff] (!%p1746_p10), %v2069_v2 }
  0x27 PF: > { %v1861_v3 = vld [vmem:[%s2143_s7 + $0x4] ss:$16 sps:$4 sm:$0xff]   ;;  %v1863_v4 = vld [vmem:[%s2143_s7 + $0xc] ss:$16 sps:$4 sm:$0xff]   ;;  %v1865_v5 = vld [vmem:[%s2143_s7] ss:$16 sps:$4 sm:$0xff]  }
  0x28   : > { %674 = vmatprep.subr.bf16.mxu0 %v1861_v3  ;;  %v1866_v6 = vld [vmem:[%s2143_s7 + $0x8] ss:$16 sps:$4 sm:$0xff]   ;;  %717 = vmatprep.subr.bf16.mxu1 %v1863_v4  ;;  %v1867_v7 = vld [vmem:[%s2143_s7 + $0x24] ss:$16 sps:$4 sm:$0xff]   ;;  %v1869_v8 = vld [vmem:[%s2143_s7 + $0x2c] ss:$16 sps:$4 sm:$0xff]  }
  0x29   : > { %675 = vmatpush1.bf16.msra.mxu0 %v1865_v5  ;;  %718 = vmatpush1.bf16.msra.mxu1 %v1866_v6  ;;  %v1871_v9 = vld [vmem:[%s2143_s7 + $0x20] ss:$16 sps:$4 sm:$0xff]   ;;  %v1872_v10 = vld [vmem:[%s2143_s7 + $0x28] ss:$16 sps:$4 sm:$0xff]   ;;  %v1873_v11 = vld [vmem:[%s2143_s7 + $0x44] ss:$16 sps:$4 sm:$0xff]  }
  0x2a   : > { %676 = vmatprep.subr.bf16.mxu0 %v1867_v7  ;;  %719 = vmatprep.subr.bf16.mxu1 %v1869_v8  ;;  %v1875_v12 = vld [vmem:[%s2143_s7 + $0x4c] ss:$16 sps:$4 sm:$0xff]   ;;  %v1877_v13 = vld [vmem:[%s2143_s7 + $0x40] ss:$16 sps:$4 sm:$0xff]   ;;  %v1878_v14 = vld [vmem:[%s2143_s7 + $0x48] ss:$16 sps:$4 sm:$0xff]  }
  0x2b   : > { %v1879_v15 = vld [vmem:[%s2143_s7 + $0x64] ss:$16 sps:$4 sm:$0xff]   ;;  %v1881_v16 = vld [vmem:[%s2143_s7 + $0x6c] ss:$16 sps:$4 sm:$0xff]   ;;  %v1883_v17 = vld [vmem:[%s2143_s7 + $0x60] ss:$16 sps:$4 sm:$0xff]  }
  0x2c   : > { %v1884_v18 = vld [vmem:[%s2143_s7 + $0x68] ss:$16 sps:$4 sm:$0xff]   ;;  %v1885_v19 = vld [vmem:[%s2143_s7 + $0x84] ss:$16 sps:$4 sm:$0xff]   ;;  %v1887_v20 = vld [vmem:[%s2143_s7 + $0x8c] ss:$16 sps:$4 sm:$0xff]  }
  0x2d   : > { %677 = vmatpush1.bf16.msra.mxu0 %v1871_v9  ;;  %720 = vmatpush1.bf16.msra.mxu1 %v1872_v10  ;;  %v1889_v21 = vld [vmem:[%s2143_s7 + $0x80] ss:$16 sps:$4 sm:$0xff]   ;;  %v1890_v22 = vld [vmem:[%s2143_s7 + $0x88] ss:$16 sps:$4 sm:$0xff]   ;;  %v1891_v23 = vld [vmem:[%s2143_s7 + $0xa4] ss:$16 sps:$4 sm:$0xff]  }
  0x2e   : > { %678 = vmatprep.subr.bf16.mxu0 %v1873_v11  ;;  %721 = vmatprep.subr.bf16.mxu1 %v1875_v12  ;;  %v1893_v24 = vld [vmem:[%s2143_s7 + $0xac] ss:$16 sps:$4 sm:$0xff]   ;;  %v1895_v25 = vld [vmem:[%s2143_s7 + $0xa0] ss:$16 sps:$4 sm:$0xff]   ;;  %v1896_v26 = vld [vmem:[%s2143_s7 + $0xa8] ss:$16 sps:$4 sm:$0xff]  }
  0x2f   : > { %v1897_v27 = vld [vmem:[%s2143_s7 + $0xc4] ss:$16 sps:$4 sm:$0xff]   ;;  %v1899_v28 = vld [vmem:[%s2143_s7 + $0xcc] ss:$16 sps:$4 sm:$0xff]   ;;  %v1901_v29 = vld [vmem:[%s2143_s7 + $0xc0] ss:$16 sps:$4 sm:$0xff]  }
  0x30   : > { %v1902_v30 = vld [vmem:[%s2143_s7 + $0xc8] ss:$16 sps:$4 sm:$0xff]   ;;  %v1903_v31 = vld [vmem:[%s2143_s7 + $0xe4] ss:$16 sps:$4 sm:$0xff]   ;;  %v1905_v32 = vld [vmem:[%s2143_s7 + $0xec] ss:$16 sps:$4 sm:$0xff]  }
  0x31   : > { %679 = vmatpush1.bf16.msra.mxu0 %v1877_v13  ;;  %722 = vmatpush1.bf16.msra.mxu1 %v1878_v14  ;;  %v1907_v33 = vld [vmem:[%s2143_s7 + $0xe0] ss:$16 sps:$4 sm:$0xff]   ;;  %v1908_v34 = vld [vmem:[%s2143_s7 + $0xe8] ss:$16 sps:$4 sm:$0xff]   ;;  %v1909_v35 = vld [vmem:[%s2143_s7 + $0x104] ss:$16 sps:$4 sm:$0xff]  }
  0x32   : > { %680 = vmatprep.subr.bf16.mxu0 %v1879_v15  ;;  %723 = vmatprep.subr.bf16.mxu1 %v1881_v16  ;;  %v1911_v36 = vld [vmem:[%s2143_s7 + $0x10c] ss:$16 sps:$4 sm:$0xff]   ;;  %v1913_v37 = vld [vmem:[%s2143_s7 + $0x100] ss:$16 sps:$4 sm:$0xff]   ;;  %v1914_v38 = vld [vmem:[%s2143_s7 + $0x108] ss:$16 sps:$4 sm:$0xff]  }
  0x33   : > { %v1915_v39 = vld [vmem:[%s2143_s7 + $0x124] ss:$16 sps:$4 sm:$0xff]   ;;  %v1917_v40 = vld [vmem:[%s2143_s7 + $0x12c] ss:$16 sps:$4 sm:$0xff]   ;;  %v1919_v41 = vld [vmem:[%s2143_s7 + $0x120] ss:$16 sps:$4 sm:$0xff]  }
  0x34   : > { %v1920_v42 = vld [vmem:[%s2143_s7 + $0x128] ss:$16 sps:$4 sm:$0xff]   ;;  %v1921_v43 = vld [vmem:[%s2143_s7 + $0x144] ss:$16 sps:$4 sm:$0xff]   ;;  %v1923_v44 = vld [vmem:[%s2143_s7 + $0x14c] ss:$16 sps:$4 sm:$0xff]  }
  0x35   : > { %681 = vmatpush1.bf16.msra.mxu0 %v1883_v17  ;;  %724 = vmatpush1.bf16.msra.mxu1 %v1884_v18  ;;  %v1925_v45 = vld [vmem:[%s2143_s7 + $0x140] ss:$16 sps:$4 sm:$0xff]   ;;  %v1926_v46 = vld [vmem:[%s2143_s7 + $0x148] ss:$16 sps:$4 sm:$0xff]   ;;  %v1927_v47 = vld [vmem:[%s2143_s7 + $0x164] ss:$16 sps:$4 sm:$0xff]  }
  0x36   : > { %682 = vmatprep.subr.bf16.mxu0 %v1885_v19  ;;  %725 = vmatprep.subr.bf16.mxu1 %v1887_v20  ;;  %v1929_v48 = vld [vmem:[%s2143_s7 + $0x16c] ss:$16 sps:$4 sm:$0xff]   ;;  %v1931_v50 = vld [vmem:[%s2143_s7 + $0x160] ss:$16 sps:$4 sm:$0xff]   ;;  %v1932_v51 = vld [vmem:[%s2143_s7 + $0x168] ss:$16 sps:$4 sm:$0xff]  }
  0x37   : > { %v1959_v49 = vld [vmem:[%s214_s8 + $0x4] ss:$8 sps:$4 sm:$0xff]   ;;  %v1937_v54 = vld [vmem:[%s2143_s7 + $0x180] ss:$16 sps:$4 sm:$0xff]   ;;  %v1938_v55 = vld [vmem:[%s2143_s7 + $0x188] ss:$16 sps:$4 sm:$0xff]  }
  0x38   : > { %v1933_v52 = vld [vmem:[%s2143_s7 + $0x184] ss:$16 sps:$4 sm:$0xff]   ;;  %v1935_v53 = vld [vmem:[%s2143_s7 + $0x18c] ss:$16 sps:$4 sm:$0xff]   ;;  %706 = vmatprep.mubr.bf16.mxu0 %v1959_v49  ;;  %749 = vmatprep.mubr.bf16.mxu1 %v1959_v49  ;;  %v1943_v58 = vld [vmem:[%s2143_s7 + $0x1a0] ss:$16 sps:$4 sm:$0xff]  }
  0x39   : > { %683 = vmatpush1.bf16.msra.mxu0 %v1889_v21  ;;  %726 = vmatpush1.bf16.msra.mxu1 %v1890_v22  ;;  %v1939_v56 = vld [vmem:[%s2143_s7 + $0x1a4] ss:$16 sps:$4 sm:$0xff]   ;;  %v1941_v57 = vld [vmem:[%s2143_s7 + $0x1ac] ss:$16 sps:$4 sm:$0xff]   ;;  %v1944_v59 = vld [vmem:[%s2143_s7 + $0x1a8] ss:$16 sps:$4 sm:$0xff]  }
  0x3a   : > { %684 = vmatprep.subr.bf16.mxu0 %v1891_v23  ;;  %727 = vmatprep.subr.bf16.mxu1 %v1893_v24  ;;  %v1945_v60 = vld [vmem:[%s2143_s7 + $0x1c4] ss:$16 sps:$4 sm:$0xff]   ;;  %v1947_v61 = vld [vmem:[%s2143_s7 + $0x1cc] ss:$16 sps:$4 sm:$0xff]   ;;  %v1949_v62 = vld [vmem:[%s2143_s7 + $0x1c0] ss:$16 sps:$4 sm:$0xff]  }
  0x3b   : > { %v1950_v63 = vld [vmem:[%s2143_s7 + $0x1c8] ss:$16 sps:$4 sm:$0xff]   ;;  %v1951_v0 = vld [vmem:[%s2143_s7 + $0x1e4] ss:$16 sps:$4 sm:$0xff]   ;;  %v1953_v1 = vld [vmem:[%s2143_s7 + $0x1ec] ss:$16 sps:$4 sm:$0xff]  }
  0x3c   : > { %v1955_v2 = vld [vmem:[%s2143_s7 + $0x1e0] ss:$16 sps:$4 sm:$0xff]   ;;  %v1956_v3 = vld [vmem:[%s2143_s7 + $0x1e8] ss:$16 sps:$4 sm:$0xff]   ;;  %p1813_p11 = scmp.ne.s32.totalorder %s2059_s14, 1 }
  0x3d   : > { %685 = vmatpush1.bf16.msra.mxu0 %v1895_v25  ;;  %728 = vmatpush1.bf16.msra.mxu1 %v1896_v26  ;;  %v1957_v4 = vld [vmem:[%s214_s8] ss:$8 sps:$4 sm:$0xff]  }
  0x3e   : > { %686 = vmatprep.subr.bf16.mxu0 %v1897_v27  ;;  %729 = vmatprep.subr.bf16.mxu1 %v1899_v28  ;;  %v270_v5 = vld [vmem:[#allocation2] sm:$0xff]  ;;  %v272_v6 = vld [vmem:[#allocation2 + $0x10] sm:$0xff]  ;;  %v271_v7 = vld [vmem:[#allocation2 + $0x8] sm:$0xff] }
  0x3f   : > { %v273_v8 = vld [vmem:[#allocation2 + $0x18] sm:$0xff]  ;;  %v274_v11 = vld [vmem:[#allocation2 + $0x20] sm:$0xff]  ;;  %v276_v12 = vld [vmem:[#allocation2 + $0x30] sm:$0xff] }
  0x40   : > { %v275_v17 = vld [vmem:[#allocation2 + $0x28] sm:$0xff]  ;;  %v277_v18 = vld [vmem:[#allocation2 + $0x38] sm:$0xff] }
  0x41   : > { %687 = vmatpush1.bf16.msra.mxu0 %v1901_v29  ;;  %730 = vmatpush1.bf16.msra.mxu1 %v1902_v30 }
  0x42   : > { %688 = vmatprep.subr.bf16.mxu0 %v1903_v31  ;;  %731 = vmatprep.subr.bf16.mxu1 %v1905_v32 }
  0x45   : > { %689 = vmatpush1.bf16.msra.mxu0 %v1907_v33  ;;  %732 = vmatpush1.bf16.msra.mxu1 %v1908_v34 }
  0x46   : > { %690 = vmatprep.subr.bf16.mxu0 %v1909_v35  ;;  %733 = vmatprep.subr.bf16.mxu1 %v1911_v36 }
  0x49   : > { %691 = vmatpush1.bf16.msra.mxu0 %v1913_v37  ;;  %734 = vmatpush1.bf16.msra.mxu1 %v1914_v38 }
  0x4a   : > { %692 = vmatprep.subr.bf16.mxu0 %v1915_v39  ;;  %735 = vmatprep.subr.bf16.mxu1 %v1917_v40 }
  0x4d   : > { %693 = vmatpush1.bf16.msra.mxu0 %v1919_v41  ;;  %736 = vmatpush1.bf16.msra.mxu1 %v1920_v42 }
  0x4e   : > { %694 = vmatprep.subr.bf16.mxu0 %v1921_v43  ;;  %737 = vmatprep.subr.bf16.mxu1 %v1923_v44 }
  0x51   : > { %695 = vmatpush1.bf16.msra.mxu0 %v1925_v45  ;;  %738 = vmatpush1.bf16.msra.mxu1 %v1926_v46 }
  0x52   : > { %696 = vmatprep.subr.bf16.mxu0 %v1927_v47  ;;  %739 = vmatprep.subr.bf16.mxu1 %v1929_v48 }
  0x55   : > { %697 = vmatpush1.bf16.msra.mxu0 %v1931_v50  ;;  %740 = vmatpush1.bf16.msra.mxu1 %v1932_v51 }
  0x56   : > { %698 = vmatprep.subr.bf16.mxu0 %v1933_v52  ;;  %741 = vmatprep.subr.bf16.mxu1 %v1935_v53 }
  0x59   : > { %699 = vmatpush1.bf16.msra.mxu0 %v1937_v54  ;;  %742 = vmatpush1.bf16.msra.mxu1 %v1938_v55 }
  0x5a   : > { %700 = vmatprep.subr.bf16.mxu0 %v1939_v56  ;;  %743 = vmatprep.subr.bf16.mxu1 %v1941_v57 }
  0x5d   : > { %701 = vmatpush1.bf16.msra.mxu0 %v1943_v58  ;;  %744 = vmatpush1.bf16.msra.mxu1 %v1944_v59 }
  0x5e   : > { %702 = vmatprep.subr.bf16.mxu0 %v1945_v60  ;;  %745 = vmatprep.subr.bf16.mxu1 %v1947_v61 }
  0x61   : > { %703 = vmatpush1.bf16.msra.mxu0 %v1949_v62  ;;  %746 = vmatpush1.bf16.msra.mxu1 %v1950_v63 }
  0x62   : > { %704 = vmatprep.subr.bf16.mxu0 %v1951_v0  ;;  %747 = vmatprep.subr.bf16.mxu1 %v1953_v1 }
  0x65   : > { %705 = vmatpush1.bf16.msra.mxu0 %v1955_v2  ;;  %748 = vmatpush1.bf16.msra.mxu1 %v1956_v3 }
  0x68   : > { %707 = vmatmul.mubr.bf16.vlgmr.msra.gmra.mrb[0].mxu0 %v1957_v4  ;;  %750 = vmatmul.mubr.bf16.vlgmr.msra.gmra.mrb[0].mxu1 %v1957_v4 }
 0x13b   : > { %v708_v9 = vpop.f32.mrb[0].mxu0  ;;  %v751_v10 = vpop.f32.mrb[0].mxu1  ;;  %779 = sbr.rel (%p1813_p11) target bundleno = 762 (0x2fa), region = 78 }
 0x13c   : > { %v760_v13 = vadd.f32 %v708_v9, %v270_v5  ;;  %v762_v14 = vadd.f32 %v751_v10, %v272_v6  ;;  %v710_v15 = vpop.f32.mrb[1].mxu0  ;;  %v753_v16 = vpop.f32.mrb[1].mxu1 }
 0x13d   : > { %v761_v19 = vadd.f32 %v710_v15, %v271_v7  ;;  %v763_v20 = vadd.f32 %v753_v16, %v273_v8  ;;  %v712_v21 = vpop.f32.mrb[2].mxu0  ;;  %v755_v22 = vpop.f32.mrb[2].mxu1 }
 0x13e   : > { %768 = vst [vmem:[#allocation2] sm:$0xff] %v760_v13  ;;  %770 = vst [vmem:[#allocation2 + $0x10] sm:$0xff] %v762_v14  ;;  %v764_v23 = vadd.f32 %v712_v21, %v274_v11  ;;  %v766_v24 = vadd.f32 %v755_v22, %v276_v12  ;;  %v714_v25 = vpop.f32.mrb[3].mxu0  ;;  %v757_v26 = vpop.f32.mrb[3].mxu1 }
 0x13f   : > { %769 = vst [vmem:[#allocation2 + $0x8] sm:$0xff] %v761_v19  ;;  %771 = vst [vmem:[#allocation2 + $0x18] sm:$0xff] %v763_v20  ;;  %v765_v27 = vadd.f32 %v714_v25, %v275_v17  ;;  %v767_v28 = vadd.f32 %v757_v26, %v277_v18 }
 0x140   : > { %772 = vst [vmem:[#allocation2 + $0x20] sm:$0xff] %v764_v23  ;;  %774 = vst [vmem:[#allocation2 + $0x30] sm:$0xff] %v766_v24 }
 0x141   : > { %773 = vst [vmem:[#allocation2 + $0x28] sm:$0xff] %v765_v27  ;;  %775 = vst [vmem:[#allocation2 + $0x38] sm:$0xff] %v767_v28 }
 0x142   : > { %v780_v29 = vld [vmem:[%s2785_s2] sm:$0xff]  ;;  %v2070_v30 = vmov 0   ;;  %v781_v31 = vld [vmem:[%s2785_s2 + $0x8] sm:$0xff]  ;;  %vm848_vm0 = vcmask 1043456  }
 0x143   : > { %1960 = vset.pattern.permute.xlu0 %v2070_v30 }
 0x144   : > { %788 = vperm.xlu0 %1960, %v780_v29  }
 0x145   : > { %v782_v32 = vld [vmem:[#allocation2] sm:$0xf]  ;;  %v784_v34 = vld [vmem:[#allocation2 + $0x10] sm:$0xf]  ;;  %v795_v36 = vld [vmem:[#allocation2] sm:$0xf0] }
 0x146   : > { %v783_v33 = vld [vmem:[#allocation2 + $0x8] sm:$0xf]  ;;  %v785_v35 = vld [vmem:[#allocation2 + $0x18] sm:$0xf]  ;;  %v796_v37 = vld [vmem:[#allocation2 + $0x8] sm:$0xf0] }
 0x147   : > { %v797_v38 = vld [vmem:[#allocation2 + $0x10] sm:$0xf0]  ;;  %v798_v39 = vld [vmem:[#allocation2 + $0x18] sm:$0xf0]  ;;  %v803_v49 = vld [vmem:[#allocation2 + $0x20] sm:$0xf] }
 0x148   : > { %809 = vperm.xlu0 %1960, %v781_v31   ;;  %v804_v50 = vld [vmem:[#allocation2 + $0x28] sm:$0xf]  ;;  %v816_v51 = vld [vmem:[#allocation2 + $0x20] sm:$0xf0]  ;;  %v817_v53 = vld [vmem:[#allocation2 + $0x28] sm:$0xf0] }
 0x149   : > { %v818_v58 = vld [vmem:[#allocation2 + $0x30] sm:$0xf0]  ;;  %v819_v59 = vld [vmem:[#allocation2 + $0x38] sm:$0xf0]  ;;  %v805_v18 = vld [vmem:[#allocation2 + $0x30] sm:$0xf] }
 0x14a   : > { %v806_v23 = vld [vmem:[#allocation2 + $0x38] sm:$0xf] }
 0x1c3   : > { %v789_v40 = vpop.permute.xlu0 %788 }
 0x1c4   : > { %v2222_v41 = vadd.f32 %v789_v40, %v782_v32  ;;  %v2224_v42 = vadd.f32 %v789_v40, %v783_v33  ;;  %v2226_v43 = vadd.f32 %v789_v40, %v784_v34  ;;  %v2228_v44 = vadd.f32 %v789_v40, %v785_v35 }
 0x1c5   : > { %v799_v45 = vadd.f32 %v795_v36, %v789_v40  ;;  %v800_v46 = vadd.f32 %v796_v37, %v789_v40  ;;  %v801_v47 = vadd.f32 %v797_v38, %v789_v40  ;;  %v802_v48 = vadd.f32 %v798_v39, %v789_v40 }
 0x1c6   : > { %v849_v54 = vsel %vm848_vm0, %v2222_v41, 0.0  ;;  %v856_v55 = vsel %vm848_vm0, %v2224_v42, 0.0  ;;  %v863_v56 = vsel %vm848_vm0, %v2226_v43, 0.0  ;;  %v870_v57 = vsel %vm848_vm0, %v2228_v44, 0.0 }
 0x1c7   : > { %v810_v52 = vpop.permute.xlu0 %809  ;;  %v2238_v60 = vrot.slane %v799_v45, 4  ;;  %v2240_v61 = vrot.slane %v800_v46, 4  ;;  %v2246_v0 = vrot.slane %v801_v47, 4  ;;  %v2248_v1 = vrot.slane %v802_v48, 4 }
 0x1c8   : > { %v2242_v62 = vadd.f32 %v810_v52, %v803_v49  ;;  %v2244_v63 = vadd.f32 %v810_v52, %v804_v50  ;;  %v850_v2 = vrot.slane %v849_v54, 4  ;;  %v857_v3 = vrot.slane %v856_v55, 4 }
 0x1c9   : > { %v864_v4 = vrot.slane %v863_v56, 4  ;;  %v871_v5 = vrot.slane %v870_v57, 4  ;;  %v820_v6 = vadd.f32 %v816_v51, %v810_v52  ;;  %v821_v7 = vadd.f32 %v817_v53, %v810_v52 }
 0x1ca   : > { %v822_v8 = vadd.f32 %v818_v58, %v810_v52  ;;  %v823_v9 = vadd.f32 %v819_v59, %v810_v52  ;;  %v851_v10 = vadd.f32 %v850_v2, %v849_v54  ;;  %v858_v11 = vadd.f32 %v857_v3, %v856_v55 }
 0x1cb   : > { %v865_v12 = vadd.f32 %v864_v4, %v863_v56  ;;  %v872_v13 = vadd.f32 %v871_v5, %v870_v57  ;;  %v877_v14 = vsel %vm848_vm0, %v2238_v60, 0.0  ;;  %v884_v15 = vsel %vm848_vm0, %v2240_v61, 0.0 }
 0x1cc   : > { %v891_v16 = vsel %vm848_vm0, %v2246_v0, 0.0  ;;  %v898_v17 = vsel %vm848_vm0, %v2248_v1, 0.0  ;;  %v852_v19 = vrot.slane %v851_v10, 2  ;;  %v859_v20 = vrot.slane %v858_v11, 2 }
 0x1cd   : > { %v866_v21 = vrot.slane %v865_v12, 2  ;;  %v873_v22 = vrot.slane %v872_v13, 2  ;;  %v878_v24 = vrot.slane %v877_v14, 4  ;;  %v885_v25 = vrot.slane %v884_v15, 4 }
 0x1ce   : > { %v892_v26 = vrot.slane %v891_v16, 4  ;;  %v899_v27 = vrot.slane %v898_v17, 4  ;;  %v853_v28 = vadd.f32 %v852_v19, %v851_v10  ;;  %v860_v29 = vadd.f32 %v859_v20, %v858_v11 }
 0x1cf   : > { %v867_v30 = vadd.f32 %v866_v21, %v865_v12  ;;  %v874_v31 = vadd.f32 %v873_v22, %v872_v13  ;;  %v879_v32 = vadd.f32 %v878_v24, %v877_v14  ;;  %v886_v33 = vadd.f32 %v885_v25, %v884_v15 }
 0x1d0   : > { %v893_v34 = vadd.f32 %v892_v26, %v891_v16  ;;  %v900_v35 = vadd.f32 %v899_v27, %v898_v17  ;;  %v2258_v36 = vadd.f32 %v810_v52, %v805_v18  ;;  %v2260_v37 = vadd.f32 %v810_v52, %v806_v23 }
 0x1d1   : > { %v854_v38 = vrot.slane %v853_v28, 1  ;;  %v861_v39 = vrot.slane %v860_v29, 1  ;;  %v868_v40 = vrot.slane %v867_v30, 1  ;;  %v875_v45 = vrot.slane %v874_v31, 1 }
 0x1d2   : > { %v880_v46 = vrot.slane %v879_v32, 2  ;;  %v887_v47 = vrot.slane %v886_v33, 2  ;;  %v2262_v48 = vrot.slane %v820_v6, 4  ;;  %v2264_v49 = vrot.slane %v821_v7, 4 }
 0x1d3   : > { %v2266_v50 = vrot.slane %v822_v8, 4  ;;  %v2268_v51 = vrot.slane %v823_v9, 4  ;;  %v894_v55 = vrot.slane %v893_v34, 2  ;;  %v901_v56 = vrot.slane %v900_v35, 2 }
 0x1d4   : > { %v881_v53 = vadd.f32 %v880_v46, %v879_v32  ;;  %v888_v54 = vadd.f32 %v887_v47, %v886_v33  ;;  %v905_v52 = vsel %vm848_vm0, %v2242_v62, 0.0  ;;  %v912_v57 = vsel %vm848_vm0, %v2244_v63, 0.0 }
 0x1d5   : > { %v919_v58 = vsel %vm848_vm0, %v2258_v36, 0.0  ;;  %v926_v59 = vsel %vm848_vm0, %v2260_v37, 0.0  ;;  %v855_v2 = vadd.f32 %v854_v38, %v853_v28  ;;  %v862_v3 = vadd.f32 %v861_v39, %v860_v29 }
 0x1d6   : > { %v2278_v4 = vadd.f32 %v868_v40, %v867_v30  ;;  %v2280_v5 = vadd.f32 %v875_v45, %v874_v31  ;;  %v906_v6 = vrot.slane %v905_v52, 4  ;;  %v913_v7 = vrot.slane %v912_v57, 4 }
 0x1d7   : > { %v920_v8 = vrot.slane %v919_v58, 4  ;;  %v927_v9 = vrot.slane %v926_v59, 4  ;;  %v882_v10 = vrot.slane %v881_v53, 1  ;;  %v889_v11 = vrot.slane %v888_v54, 1 }
 0x1d8   : > { %v895_v12 = vadd.f32 %v894_v55, %v893_v34  ;;  %v902_v13 = vadd.f32 %v901_v56, %v900_v35  ;;  %v907_v14 = vadd.f32 %v906_v6, %v905_v52  ;;  %v914_v15 = vadd.f32 %v913_v7, %v912_v57 }
 0x1d9   : > { %v921_v16 = vadd.f32 %v920_v8, %v919_v58  ;;  %v928_v17 = vadd.f32 %v927_v9, %v926_v59  ;;  %v933_v18 = vsel %vm848_vm0, %v2262_v48, 0.0  ;;  %v940_v19 = vsel %vm848_vm0, %v2264_v49, 0.0 }
 0x1da   : > { %v947_v20 = vsel %vm848_vm0, %v2266_v50, 0.0  ;;  %v954_v21 = vsel %vm848_vm0, %v2268_v51, 0.0  ;;  %v908_v22 = vrot.slane %v907_v14, 2  ;;  %v915_v23 = vrot.slane %v914_v15, 2 }
 0x1db   : > { %v922_v24 = vrot.slane %v921_v16, 2  ;;  %v929_v25 = vrot.slane %v928_v17, 2  ;;  %v934_v26 = vrot.slane %v933_v18, 4  ;;  %v941_v27 = vrot.slane %v940_v19, 4 }
 0x1dc   : > { %v948_v28 = vrot.slane %v947_v20, 4  ;;  %v955_v29 = vrot.slane %v954_v21, 4  ;;  %v896_v30 = vrot.slane %v895_v12, 1  ;;  %v909_v31 = vadd.f32 %v908_v22, %v907_v14 }
 0x1dd   : > { %v916_v32 = vadd.f32 %v915_v23, %v914_v15  ;;  %v923_v33 = vadd.f32 %v922_v24, %v921_v16  ;;  %v935_v34 = vadd.f32 %v934_v26, %v933_v18  ;;  %v942_v35 = vadd.f32 %v941_v27, %v940_v19 }
 0x1de   : > { %v949_v38 = vadd.f32 %v948_v28, %v947_v20  ;;  %v956_v39 = vadd.f32 %v955_v29, %v954_v21  ;;  %v903_v40 = vrot.slane %v902_v13, 1  ;;  %v910_v45 = vrot.slane %v909_v31, 1 }
 0x1df   : > { %v917_v46 = vrot.slane %v916_v32, 1  ;;  %v930_v47 = vadd.f32 %v929_v25, %v928_v17  ;;  %v936_v55 = vrot.slane %v935_v34, 2  ;;  %v943_v56 = vrot.slane %v942_v35, 2 }
 0x1e0   : > { %v950_v52 = vrot.slane %v949_v38, 2  ;;  %v957_v57 = vrot.slane %v956_v39, 2  ;;  %v883_v58 = vadd.f32 %v882_v10, %v881_v53  ;;  %v890_v59 = vadd.f32 %v889_v11, %v888_v54 }
 0x1e1   : > { %v897_v6 = vadd.f32 %v896_v30, %v895_v12  ;;  %v924_v7 = vrot.slane %v923_v33, 1  ;;  %v937_v8 = vadd.f32 %v936_v55, %v935_v34  ;;  %v944_v9 = vadd.f32 %v943_v56, %v942_v35 }
 0x1e2   : > { %v951_v14 = vadd.f32 %v950_v52, %v949_v38  ;;  %v958_v15 = vadd.f32 %v957_v57, %v956_v39  ;;  %v904_v16 = vadd.f32 %v903_v40, %v902_v13  ;;  %v911_v18 = vadd.f32 %v910_v45, %v909_v31 }
 0x1e3   : > { %v918_v19 = vadd.f32 %v917_v46, %v916_v32  ;;  %v931_v20 = vrot.slane %v930_v47, 1  ;;  %v938_v21 = vrot.slane %v937_v8, 1  ;;  %v945_v22 = vrot.slane %v944_v9, 1 }
 0x1e4   : > { %v952_v23 = vrot.slane %v951_v14, 1  ;;  %v959_v17 = vrot.slane %v958_v15, 1  ;;  %v925_v24 = vadd.f32 %v924_v7, %v923_v33  ;;  %v2290_v25 = vmul.f32 0.25, %v855_v2 }
 0x1e5   : > { %v2292_v26 = vmul.f32 0.25, %v862_v3  ;;  %v2294_v53 = vmul.f32 0.25, %v883_v58  ;;  %v939_v54 = vadd.f32 %v938_v21, %v937_v8  ;;  %v946_v10 = vadd.f32 %v945_v22, %v944_v9 }
 0x1e6   : > { %v953_v11 = vadd.f32 %v952_v23, %v951_v14  ;;  %v2296_v12 = vmul.f32 0.25, %v890_v59  ;;  %v932_v13 = vadd.f32 %v931_v20, %v930_v47  ;;  %v960_v27 = vadd.f32 %v959_v17, %v958_v15 }
 0x1e7   : > { %v2298_v28 = vmul.f32 0.25, %v911_v18  ;;  %v2300_v29 = vmul.f32 0.25, %v918_v19  ;;  %v2303_v30 = vmul.f32 0.25, %v2278_v4  ;;  %v2305_v2 = vmul.f32 0.25, %v897_v6 }
 0x1e8   : > { %v2307_v3 = vmul.f32 0.25, %v939_v54  ;;  %v2309_v31 = vmul.f32 0.25, %v946_v10  ;;  %v2312_v32 = vmul.f32 0.25, %v2280_v5  ;;  %v2314_v33 = vmul.f32 0.25, %v925_v24 }
 0x1e9   : > { %v977_v34 = vmul.f32 %v2290_v25, %v2290_v25  ;;  %v978_v35 = vmul.f32 %v2292_v26, %v2292_v26  ;;  %v2320_v38 = vmul.f32 0.25, %v904_v16  ;;  %v2322_v4 = vmul.f32 0.25, %v953_v11 }
 0x1ea   : > { %v981_v39 = vmul.f32 %v2294_v53, %v2294_v53  ;;  %v982_v40 = vmul.f32 %v2296_v12, %v2296_v12  ;;  %v2328_v5 = vmul.f32 0.25, %v932_v13  ;;  %v2330_v45 = vmul.f32 0.25, %v960_v27 }
 0x1eb   : > { %v985_v46 = vmul.f32 %v2298_v28, %v2298_v28  ;;  %v986_v47 = vmul.f32 %v2300_v29, %v2300_v29  ;;  %v979_v55 = vmul.f32 %v2303_v30, %v2303_v30  ;;  %v983_v56 = vmul.f32 %v2305_v2, %v2305_v2 }
 0x1ec   : > { %v989_v52 = vmul.f32 %v2307_v3, %v2307_v3  ;;  %v990_v57 = vmul.f32 %v2309_v31, %v2309_v31  ;;  %v987_v58 = vmul.f32 %v2314_v33, %v2314_v33  ;;  %v993_v59 = vadd.f32 %v978_v35, %v977_v34 }
 0x1ed   : > { %v996_v6 = vadd.f32 %v982_v40, %v981_v39  ;;  %v999_v7 = vadd.f32 %v986_v47, %v985_v46  ;;  %v980_v8 = vmul.f32 %v2312_v32, %v2312_v32  ;;  %v984_v9 = vmul.f32 %v2320_v38, %v2320_v38 }
 0x1ee   : > { %v991_v14 = vmul.f32 %v2322_v4, %v2322_v4  ;;  %v1002_v15 = vadd.f32 %v990_v57, %v989_v52  ;;  %v988_v16 = vmul.f32 %v2328_v5, %v2328_v5  ;;  %v994_v18 = vadd.f32 %v993_v59, %v979_v55 }
 0x1ef   : > { %v997_v19 = vadd.f32 %v996_v6, %v983_v56  ;;  %v1000_v20 = vadd.f32 %v999_v7, %v987_v58  ;;  %v992_v21 = vmul.f32 %v2330_v45, %v2330_v45 }
 0x1f0   : > { %v1003_v22 = vadd.f32 %v1002_v15, %v991_v14  ;;  %v995_v23 = vadd.f32 %v994_v18, %v980_v8 }
 0x1f1   : > { %v998_v17 = vadd.f32 %v997_v19, %v984_v9  ;;  %v1001_v24 = vadd.f32 %v1000_v20, %v988_v16 }
 0x1f2   : > { %v1004_v54 = vadd.f32 %v1003_v22, %v992_v21  ;;  %1961 = vrsqrt.f32 %v995_v23  ;;  %v1033_v10 = vadd.f32 1.0, %v995_v23  ;;  %vm1007_vm1 = vcmp.eq.f32.partialorder %v995_v23, inf }
 0x1f3   : > { %1963 = vrsqrt.f32 %v998_v17  ;;  %v1034_v11 = vadd.f32 1.0, %v998_v17  ;;  %v1035_v13 = vadd.f32 1.0, %v1001_v24  ;;  %vm1009_vm2 = vcmp.eq.f32.partialorder %v995_v23, 0.0 }
 0x1f4   : > { %1965 = vrsqrt.f32 %v1001_v24  ;;  %v1036_v27 = vadd.f32 1.0, %v1004_v54  ;;  %v1010_v40 = vand.u32 2147483648, %v995_v23  ;;  %vm1014_vm3 = vcmp.eq.f32.partialorder %v998_v17, inf }
 0x1f5   : > { %1967 = vrsqrt.f32 %v1004_v54  ;;  %vm1016_vm4 = vcmp.eq.f32.partialorder %v998_v17, 0.0  ;;  %v1017_v55 = vand.u32 2147483648, %v998_v17  ;;  %vm1021_vm5 = vcmp.eq.f32.partialorder %v1001_v24, inf }
 0x1f6   : > { %1969 = vrcp.f32 %v1033_v10  ;;  %vm1023_vm6 = vcmp.eq.f32.partialorder %v1001_v24, 0.0  ;;  %v1024_v6 = vand.u32 2147483648, %v1001_v24  ;;  %vm1028_vm7 = vcmp.eq.f32.partialorder %v1004_v54, inf }
 0x1f7   : > { %1971 = vrcp.f32 %v1034_v11  ;;  %v1031_v14 = vand.u32 2147483648, %v1004_v54  ;;  %vm1030_vm8 = vcmp.eq.f32.partialorder %v1004_v54, 0.0 }
 0x1f8   : > { %1973 = vrcp.f32 %v1035_v13 }
 0x1f9   : > { %1975 = vrcp.f32 %v1036_v27 }
 0x1fc   : > { %v1962_v34 = vpop.eup %1961 }
 0x1fd   : > { %v1964_v35 = vpop.eup %1963  ;;  %v1006_v39 = vmul.f32 %v1962_v34, %v995_v23 }
 0x1fe   : > { %v1966_v46 = vpop.eup %1965  ;;  %v1013_v47 = vmul.f32 %v1964_v35, %v998_v17 }
 0x1ff   : > { %v1968_v56 = vpop.eup %1967  ;;  %v1008_v52 = vsel %vm1007_vm1, %v995_v23, %v1006_v39  ;;  %v1020_v57 = vmul.f32 %v1966_v46, %v1001_v24 }
 0x200   : > { %v1011_v58 = vsel %vm1009_vm2, %v1010_v40, %v1008_v52  ;;  %v1015_v59 = vsel %vm1014_vm3, %v998_v17, %v1013_v47  ;;  %v1027_v7 = vmul.f32 %v1968_v56, %v1004_v54  ;;  %v1970_v15 = vpop.eup %1969 }
 0x201   : > { %v1018_v8 = vsel %vm1016_vm4, %v1017_v55, %v1015_v59  ;;  %v1022_v9 = vsel %vm1021_vm5, %v1001_v24, %v1020_v57  ;;  %v1972_v19 = vpop.eup %1971  ;;  %v1041_v21 = vmul.f32 %v1970_v15, %v1011_v58 }
 0x202   : > { %v1025_v16 = vsel %vm1023_vm6, %v1024_v6, %v1022_v9  ;;  %v1029_v18 = vsel %vm1028_vm7, %v1004_v54, %v1027_v7  ;;  %v1974_v22 = vpop.eup %1973  ;;  %v1042_v23 = vmul.f32 %v1972_v19, %v1018_v8 }
 0x203   : > { %v1032_v20 = vsel %vm1030_vm8, %v1031_v14, %v1029_v18  ;;  %v1976_v10 = vpop.eup %1975  ;;  %v1043_v11 = vmul.f32 %v1974_v22, %v1025_v16  ;;  %v1045_v13 = vmul.f32 %v1041_v21, %v2290_v25  ;;  %v1046_v17 = vmul.f32 %v1041_v21, %v2292_v26 }
 0x204   : > { %v1044_v27 = vmul.f32 %v1976_v10, %v1032_v20  ;;  %v1049_v24 = vmul.f32 %v1042_v23, %v2294_v53  ;;  %v1047_v34 = vmul.f32 %v1041_v21, %v2303_v30  ;;  %v1050_v35 = vmul.f32 %v1042_v23, %v2296_v12 }
 0x205   : > { %v1053_v54 = vmul.f32 %v1043_v11, %v2298_v28  ;;  %v1048_v39 = vmul.f32 %v1041_v21, %v2312_v32  ;;  %v1051_v40 = vmul.f32 %v1042_v23, %v2305_v2  ;;  %v1052_v46 = vmul.f32 %v1042_v23, %v2320_v38 }
 0x206   : > { %v1054_v47 = vmul.f32 %v1043_v11, %v2300_v29  ;;  %v1057_v25 = vmul.f32 %v1044_v27, %v2307_v3  ;;  %v1058_v26 = vmul.f32 %v1044_v27, %v2309_v31  ;;  %v1061_v53 = vmul.f32 %v1045_v13, %v2222_v41 }
 0x207   : > { %v1062_v30 = vmul.f32 %v1046_v17, %v2224_v42  ;;  %v1055_v12 = vmul.f32 %v1043_v11, %v2314_v33  ;;  %v1056_v28 = vmul.f32 %v1043_v11, %v2328_v5  ;;  %v1059_v32 = vmul.f32 %v1044_v27, %v2322_v4 }
 0x208   : > { %v1065_v2 = vmul.f32 %v1049_v24, %v2238_v60  ;;  %v1060_v38 = vmul.f32 %v1044_v27, %v2330_v45  ;;  %v1063_v29 = vmul.f32 %v1047_v34, %v2226_v43  ;;  %v1066_v3 = vmul.f32 %v1050_v35, %v2240_v61 }
 0x209   : > { %v1069_v31 = vmul.f32 %v1053_v54, %v2242_v62  ;;  %v1064_v55 = vmul.f32 %v1048_v39, %v2228_v44  ;;  %v1067_v56 = vmul.f32 %v1051_v40, %v2246_v0  ;;  %v1068_v33 = vmul.f32 %v1052_v46, %v2248_v1 }
 0x20a   : > { %v1070_v5 = vmul.f32 %v1054_v47, %v2244_v63  ;;  %v1073_v4 = vmul.f32 %v1057_v25, %v2262_v48  ;;  %v1074_v52 = vmul.f32 %v1058_v26, %v2264_v49  ;;  %v1077_v45 = vsel %vm848_vm0, %v1061_v53, 0.0 }
 0x20b   : > { %v1078_v57 = vsel %vm848_vm0, %v1062_v30, 0.0  ;;  %v1071_v58 = vmul.f32 %v1055_v12, %v2258_v36  ;;  %v1072_v59 = vmul.f32 %v1056_v28, %v2260_v37  ;;  %v1084_v7 = vsel %vm848_vm0, %v1065_v2, 0.0 }
 0x20c   : > { %v1079_v6 = vadd.f32 %v1078_v57, %v1077_v45  ;;  %v1075_v8 = vmul.f32 %v1059_v32, %v2266_v50  ;;  %v1080_v9 = vsel %vm848_vm0, %v1063_v29, 0.0  ;;  %v1085_v14 = vsel %vm848_vm0, %v1066_v3, 0.0 }
 0x20d   : > { %v1091_v15 = vsel %vm848_vm0, %v1069_v31, 0.0  ;;  %v1076_v16 = vmul.f32 %v1060_v38, %v2268_v51  ;;  %v1086_v19 = vadd.f32 %v1085_v14, %v1084_v7  ;;  %v1092_v20 = vsel %vm848_vm0, %v1070_v5, 0.0 }
 0x20e   : > { %v1081_v18 = vadd.f32 %v1080_v9, %v1079_v6  ;;  %v1087_v21 = vsel %vm848_vm0, %v1067_v56, 0.0  ;;  %v1093_v22 = vadd.f32 %v1092_v20, %v1091_v15  ;;  %v1098_v23 = vsel %vm848_vm0, %v1073_v4, 0.0 }
 0x20f   : > { %v1099_v10 = vsel %vm848_vm0, %v1074_v52, 0.0  ;;  %v1088_v11 = vadd.f32 %v1087_v21, %v1086_v19  ;;  %v1094_v13 = vsel %vm848_vm0, %v1071_v58, 0.0  ;;  %v1082_v27 = vsel %vm848_vm0, %v1064_v55, 0.0 }
 0x210   : > { %v1100_v17 = vadd.f32 %v1099_v10, %v1098_v23  ;;  %v1089_v24 = vsel %vm848_vm0, %v1068_v33, 0.0  ;;  %v1095_v34 = vadd.f32 %v1094_v13, %v1093_v22  ;;  %v1101_v35 = vsel %vm848_vm0, %v1075_v8, 0.0 }
 0x211   : > { %v2402_v54 = vadd.f32 %v1082_v27, %v1081_v18  ;;  %v2404_v39 = vadd.f32 %v1089_v24, %v1088_v11  ;;  %v1096_v40 = vsel %vm848_vm0, %v1072_v59, 0.0  ;;  %v1103_v25 = vsel %vm848_vm0, %v1076_v16, 0.0 }
 0x212   : > { %v1102_v46 = vadd.f32 %v1101_v35, %v1100_v17  ;;  %v2407_v47 = vadd.f32 %v1096_v40, %v1095_v34 }
 0x213   : > { %2790 = vst [vmem:[#allocation4_spill] sm:$0xff] %v2404_v39  ;;  %v1106_v53 = vsel %vm848_vm0, %v2404_v39, -inf  ;;  %v1105_v30 = vsel %vm848_vm0, %v2402_v54, -inf }
 0x214   : > { %2791 = vst [vmem:[#allocation5_spill] sm:$0xff] %v2407_v47  ;;  %v2410_v26 = vadd.f32 %v1103_v25, %v1102_v46  ;;  %v1107_v12 = vsel %vm848_vm0, %v2407_v47, -inf  ;;  %v1109_v32 = vmax.f32 %v1105_v30, %v1106_v53 }
 0x216   : > { %2792 = vst [vmem:[#allocation6_spill] sm:$0xff] %v2410_v26  ;;  %v1108_v28 = vsel %vm848_vm0, %v2410_v26, -inf }
 0x217   : > { %v1110_v2 = vmax.f32 %v1107_v12, %v1108_v28 }
 0x219   : > { %v1111_v38 = vmax.f32 %v1109_v32, %v1110_v2 }
 0x21b   : > { %v1112_v29 = vsub.f32 %v2402_v54, %v1111_v38  ;;  %v1113_v3 = vsub.f32 %v2404_v39, %v1111_v38  ;;  %v1114_v31 = vsub.f32 %v2407_v47, %v1111_v38  ;;  %v1115_v55 = vsub.f32 %v2410_v26, %v1111_v38 }
 0x21d   : > { %v1116_v56 = vmul.f32 1.442695, %v1112_v29  ;;  %v1118_v33 = vmul.f32 1.442695, %v1113_v3  ;;  %v1120_v5 = vmul.f32 1.442695, %v1114_v31 }
 0x21e   : > { %v1122_v4 = vmul.f32 1.442695, %v1115_v55 }
 0x21f   : > { %1977 = vpow2.f32 %v1116_v56 }
 0x220   : > { %1979 = vpow2.f32 %v1118_v33 }
 0x221   : > { %1981 = vpow2.f32 %v1120_v5 }
 0x222   : > { %1983 = vpow2.f32 %v1122_v4 }
 0x229   : > { %v1978_v52 = vpop.eup %1977 }
 0x22a   : > { %v1980_v45 = vpop.eup %1979  ;;  %v1124_v57 = vsel %vm848_vm0, %v1978_v52, 0.0 }
 0x22b   : > { %v1982_v58 = vpop.eup %1981  ;;  %v1125_v59 = vsel %vm848_vm0, %v1980_v45, 0.0 }
 0x22c   : > { %v1984_v6 = vpop.eup %1983  ;;  %v1126_v7 = vadd.f32 %v1125_v59, %v1124_v57  ;;  %v1127_v8 = vsel %vm848_vm0, %v1982_v58, 0.0 }
 0x22d   : > { %v1129_v14 = vsel %vm848_vm0, %v1984_v6, 0.0 }
 0x22e   : > { %v1128_v9 = vadd.f32 %v1127_v8, %v1126_v7 }
 0x230   : > { %v1130_v15 = vadd.f32 %v1129_v14, %v1128_v9 }
 0x232   : > { %1985 = vrcp.f32 %v1130_v15 }
 0x23c   : > { %v1986_v16 = vpop.eup %1985 }
 0x23d   : > { %v1132_v18 = vmul.f32 %v1986_v16, %v1978_v52  ;;  %v1133_v19 = vmul.f32 %v1986_v16, %v1980_v45  ;;  %v1134_v20 = vmul.f32 %v1986_v16, %v1982_v58  ;;  %v1135_v24 = vmul.f32 %v1986_v16, %v1984_v6 }
 0x23f   : > { %v1136_v21 = vmul.f32 %v1132_v18, %v2222_v41  ;;  %v1137_v22 = vmul.f32 %v1132_v18, %v2224_v42  ;;  %v1138_v23 = vmul.f32 %v1132_v18, %v2226_v43  ;;  %v1139_v10 = vmul.f32 %v1132_v18, %v2228_v44 }
 0x240   : > { %v1140_v11 = vmul.f32 %v1133_v19, %v2238_v60  ;;  %v1141_v13 = vmul.f32 %v1133_v19, %v2240_v61  ;;  %v1142_v17 = vmul.f32 %v1133_v19, %v2246_v0  ;;  %v1143_v27 = vmul.f32 %v1133_v19, %v2248_v1 }
 0x241   : > { %v1144_v34 = vmul.f32 %v1134_v20, %v2242_v62  ;;  %v1145_v35 = vmul.f32 %v1134_v20, %v2244_v63  ;;  %v1152_v40 = vsel %vm848_vm0, %v1136_v21, 0.0  ;;  %v1159_v46 = vsel %vm848_vm0, %v1137_v22, 0.0 }
 0x242   : > { %v1166_v25 = vsel %vm848_vm0, %v1138_v23, 0.0  ;;  %v1173_v53 = vsel %vm848_vm0, %v1139_v10, 0.0  ;;  %v1153_v30 = vrot.slane %v1152_v40, 4  ;;  %v1160_v12 = vrot.slane %v1159_v46, 4 }
 0x243   : > { %v1167_v28 = vrot.slane %v1166_v25, 4  ;;  %v1174_v32 = vrot.slane %v1173_v53, 4  ;;  %v1180_v2 = vsel %vm848_vm0, %v1140_v11, 0.0  ;;  %v1187_v38 = vsel %vm848_vm0, %v1141_v13, 0.0 }
 0x244   : > { %v1194_v29 = vsel %vm848_vm0, %v1142_v17, 0.0  ;;  %v1201_v3 = vsel %vm848_vm0, %v1143_v27, 0.0  ;;  %v1154_v31 = vadd.f32 %v1153_v30, %v1152_v40  ;;  %v1161_v55 = vadd.f32 %v1160_v12, %v1159_v46 }
 0x245   : > { %v1168_v56 = vadd.f32 %v1167_v28, %v1166_v25  ;;  %v1175_v33 = vadd.f32 %v1174_v32, %v1173_v53  ;;  %v1181_v5 = vrot.slane %v1180_v2, 4  ;;  %v1188_v4 = vrot.slane %v1187_v38, 4 }
 0x246   : > { %v1195_v52 = vrot.slane %v1194_v29, 4  ;;  %v1202_v45 = vrot.slane %v1201_v3, 4  ;;  %v1155_v57 = vrot.slane %v1154_v31, 2  ;;  %v1162_v58 = vrot.slane %v1161_v55, 2 }
 0x247   : > { %v1169_v59 = vrot.slane %v1168_v56, 2  ;;  %v1176_v6 = vrot.slane %v1175_v33, 2  ;;  %v1182_v7 = vadd.f32 %v1181_v5, %v1180_v2  ;;  %v1189_v8 = vadd.f32 %v1188_v4, %v1187_v38 }
 0x248   : > { %v1196_v9 = vadd.f32 %v1195_v52, %v1194_v29  ;;  %v1203_v14 = vadd.f32 %v1202_v45, %v1201_v3  ;;  %v1156_v15 = vadd.f32 %v1155_v57, %v1154_v31  ;;  %v1163_v16 = vadd.f32 %v1162_v58, %v1161_v55 }
 0x249   : > { %v1170_v18 = vadd.f32 %v1169_v59, %v1168_v56  ;;  %v2446_v19 = vadd.f32 %v1176_v6, %v1175_v33  ;;  %v1183_v21 = vrot.slane %v1182_v7, 2  ;;  %v1190_v22 = vrot.slane %v1189_v8, 2 }
 0x24a   : > { %v1197_v23 = vrot.slane %v1196_v9, 2  ;;  %v1204_v10 = vrot.slane %v1203_v14, 2  ;;  %v1146_v11 = vmul.f32 %v1134_v20, %v2258_v36  ;;  %v1147_v13 = vmul.f32 %v1134_v20, %v2260_v37 }
 0x24b   : > { %v1157_v17 = vrot.slane %v1156_v15, 1  ;;  %v1164_v27 = vrot.slane %v1163_v16, 1  ;;  %v1171_v40 = vrot.slane %v1170_v18, 1  ;;  %v1184_v46 = vadd.f32 %v1183_v21, %v1182_v7 }
 0x24c   : > { %v1191_v25 = vadd.f32 %v1190_v22, %v1189_v8  ;;  %v2450_v53 = vadd.f32 %v1197_v23, %v1196_v9  ;;  %v1148_v30 = vmul.f32 %v1135_v24, %v2262_v48  ;;  %v1149_v12 = vmul.f32 %v1135_v24, %v2264_v49 }
 0x24d   : > { %v1150_v28 = vmul.f32 %v1135_v24, %v2266_v50  ;;  %v1151_v32 = vmul.f32 %v1135_v24, %v2268_v51  ;;  %v2456_v2 = vadd.f32 %v1157_v17, %v1156_v15  ;;  %v2458_v38 = vadd.f32 %v1164_v27, %v1163_v16 }
 0x24e   : > { %v1178_v20 = vrot.slane %v2446_v19, 1  ;;  %v2461_v29 = vadd.f32 %v1204_v10, %v1203_v14  ;;  %v1208_v3 = vsel %vm848_vm0, %v1144_v34, 0.0  ;;  %v1215_v31 = vsel %vm848_vm0, %v1145_v35, 0.0 }
 0x24f   : > { %v1222_v55 = vsel %vm848_vm0, %v1146_v11, 0.0  ;;  %v1229_v56 = vsel %vm848_vm0, %v1147_v13, 0.0  ;;  %v2467_v33 = vadd.f32 %v1171_v40, %v1170_v18  ;;  %v1185_v5 = vrot.slane %v1184_v46, 1 }
 0x250   : > { %v1192_v24 = vrot.slane %v1191_v25, 1  ;;  %v1199_v4 = vrot.slane %v2450_v53, 1  ;;  %v1209_v52 = vrot.slane %v1208_v3, 4  ;;  %v1216_v45 = vrot.slane %v1215_v31, 4 }
 0x251   : > { %v1223_v57 = vrot.slane %v1222_v55, 4  ;;  %v1230_v58 = vrot.slane %v1229_v56, 4  ;;  %v1236_v59 = vsel %vm848_vm0, %v1148_v30, 0.0  ;;  %v1243_v34 = vsel %vm848_vm0, %v1149_v12, 0.0 }
 0x252   : > { %v1250_v35 = vsel %vm848_vm0, %v1150_v28, 0.0  ;;  %v1257_v6 = vsel %vm848_vm0, %v1151_v32, 0.0  ;;  %v1210_v7 = vadd.f32 %v1209_v52, %v1208_v3  ;;  %v1217_v8 = vadd.f32 %v1216_v45, %v1215_v31 }
 0x253   : > { %v1224_v9 = vadd.f32 %v1223_v57, %v1222_v55  ;;  %v1231_v14 = vadd.f32 %v1230_v58, %v1229_v56  ;;  %v1237_v15 = vrot.slane %v1236_v59, 4  ;;  %v1244_v16 = vrot.slane %v1243_v34, 4 }
 0x254   : > { %v1251_v18 = vrot.slane %v1250_v35, 4  ;;  %v1258_v21 = vrot.slane %v1257_v6, 4  ;;  %v1211_v22 = vrot.slane %v1210_v7, 2  ;;  %v1218_v23 = vrot.slane %v1217_v8, 2 }
 0x255   : > { %v1225_v10 = vrot.slane %v1224_v9, 2  ;;  %v1232_v11 = vrot.slane %v1231_v14, 2  ;;  %v1238_v13 = vadd.f32 %v1237_v15, %v1236_v59  ;;  %v1245_v17 = vadd.f32 %v1244_v16, %v1243_v34 }
 0x256   : > { %v1252_v27 = vadd.f32 %v1251_v18, %v1250_v35  ;;  %v1259_v40 = vadd.f32 %v1258_v21, %v1257_v6  ;;  %v1212_v30 = vadd.f32 %v1211_v22, %v1210_v7  ;;  %v1219_v12 = vadd.f32 %v1218_v23, %v1217_v8 }
 0x257   : > { %v1226_v28 = vadd.f32 %v1225_v10, %v1224_v9  ;;  %v1233_v32 = vadd.f32 %v1232_v11, %v1231_v14  ;;  %v1239_v3 = vrot.slane %v1238_v13, 2  ;;  %v1246_v31 = vrot.slane %v1245_v17, 2 }
 0x258   : > { %v1253_v55 = vrot.slane %v1252_v27, 2  ;;  %v1260_v56 = vrot.slane %v1259_v40, 2  ;;  %v1206_v52 = vrot.slane %v2461_v29, 1  ;;  %v1213_v45 = vrot.slane %v1212_v30, 1 }
 0x259   : > { %v1220_v57 = vrot.slane %v1219_v12, 1  ;;  %v1227_v58 = vrot.slane %v1226_v28, 1  ;;  %v1240_v26 = vadd.f32 %v1239_v3, %v1238_v13  ;;  %v1247_v47 = vadd.f32 %v1246_v31, %v1245_v17 }
 0x25a   : > { %v1254_v39 = vadd.f32 %v1253_v55, %v1252_v27  ;;  %v1261_v59 = vadd.f32 %v1260_v56, %v1259_v40  ;;  %v2475_v34 = vadd.f32 %v1185_v5, %v1184_v46  ;;  %v2477_v35 = vadd.f32 %v1192_v24, %v1191_v25 }
 0x25b   : > { %v2479_v6 = vadd.f32 %v1213_v45, %v1212_v30  ;;  %v1234_v7 = vrot.slane %v1233_v32, 1  ;;  %v2481_v8 = vadd.f32 %v1220_v57, %v1219_v12  ;;  %v1241_v9 = vrot.slane %v1240_v26, 1 }
 0x25c   : > { %v1248_v14 = vrot.slane %v1247_v47, 1  ;;  %v1255_v15 = vrot.slane %v1254_v39, 1  ;;  %v2484_v16 = vadd.f32 %v1178_v20, %v2446_v19  ;;  %v2487_v18 = vadd.f32 %v1199_v4, %v2450_v53 }
 0x25d   : > { %v2489_v21 = vadd.f32 %v1227_v58, %v1226_v28  ;;  %v1262_v46 = vrot.slane %v1261_v59, 1  ;;  %v2491_v5 = vadd.f32 %v1241_v9, %v1240_v26  ;;  %v1264_v24 = vmul.f32 %v2456_v2, %v2456_v2 }
 0x25e   : > { %v2493_v25 = vadd.f32 %v1248_v14, %v1247_v47  ;;  %v1265_v22 = vmul.f32 %v2458_v38, %v2458_v38  ;;  %v2500_v23 = vadd.f32 %v1206_v52, %v2461_v29  ;;  %v2502_v19 = vadd.f32 %v1255_v15, %v1254_v39 }
 0x25f   : > { %v1268_v53 = vmul.f32 %v2475_v34, %v2475_v34  ;;  %v1269_v26 = vmul.f32 %v2477_v35, %v2477_v35  ;;  %v2508_v20 = vadd.f32 %v1234_v7, %v1233_v32  ;;  %v1266_v47 = vmul.f32 %v2467_v33, %v2467_v33 }
 0x260   : > { %v1272_v4 = vmul.f32 %v2479_v6, %v2479_v6  ;;  %v1273_v29 = vmul.f32 %v2481_v8, %v2481_v8  ;;  %v2516_v10 = vadd.f32 %v1262_v46, %v1261_v59  ;;  %v1270_v39 = vmul.f32 %v2487_v18, %v2487_v18 }
 0x261   : > { %v1276_v11 = vmul.f32 %v2491_v5, %v2491_v5  ;;  %v1277_v13 = vmul.f32 %v2493_v25, %v2493_v25  ;;  %v1274_v17 = vmul.f32 %v2489_v21, %v2489_v21  ;;  %v1280_v27 = vadd.f32 %v1265_v22, %v1264_v24 }
 0x262   : > { %v1283_v40 = vadd.f32 %v1269_v26, %v1268_v53  ;;  %v1286_v30 = vadd.f32 %v1273_v29, %v1272_v4  ;;  %v1267_v12 = vmul.f32 %v2484_v16, %v2484_v16  ;;  %v1271_v28 = vmul.f32 %v2500_v23, %v2500_v23 }
 0x263   : > { %v1278_v32 = vmul.f32 %v2502_v19, %v2502_v19  ;;  %v1289_v3 = vadd.f32 %v1277_v13, %v1276_v11  ;;  %v1275_v31 = vmul.f32 %v2508_v20, %v2508_v20  ;;  %v1281_v55 = vadd.f32 %v1280_v27, %v1266_v47 }
 0x264   : > { %v1284_v56 = vadd.f32 %v1283_v40, %v1270_v39  ;;  %v1287_v52 = vadd.f32 %v1286_v30, %v1274_v17  ;;  %v1279_v45 = vmul.f32 %v2516_v10, %v2516_v10 }
 0x265   : > { %v1290_v57 = vadd.f32 %v1289_v3, %v1278_v32  ;;  %v1282_v58 = vadd.f32 %v1281_v55, %v1267_v12 }
 0x266   : > { %v1285_v59 = vadd.f32 %v1284_v56, %v1271_v28  ;;  %v1288_v7 = vadd.f32 %v1287_v52, %v1275_v31 }
 0x267   : > { %v1291_v9 = vadd.f32 %v1290_v57, %v1279_v45  ;;  %1987 = vrsqrt.f32 %v1282_v58  ;;  %v1320_v14 = vadd.f32 1.0, %v1282_v58  ;;  %vm1294_vm9 = vcmp.eq.f32.partialorder %v1282_v58, inf }
 0x268   : > { %1989 = vrsqrt.f32 %v1285_v59  ;;  %v1321_v15 = vadd.f32 1.0, %v1285_v59  ;;  %v1322_v46 = vadd.f32 1.0, %v1288_v7  ;;  %vm1296_vm10 = vcmp.eq.f32.partialorder %v1282_v58, 0.0 }
 0x269   : > { %1991 = vrsqrt.f32 %v1288_v7  ;;  %v1323_v24 = vadd.f32 1.0, %v1291_v9  ;;  %v1297_v47 = vand.u32 2147483648, %v1282_v58  ;;  %vm1301_vm11 = vcmp.eq.f32.partialorder %v1285_v59, inf }
 0x26a   : > { %1993 = vrsqrt.f32 %v1291_v9  ;;  %vm1303_vm12 = vcmp.eq.f32.partialorder %v1285_v59, 0.0  ;;  %v1304_v39 = vand.u32 2147483648, %v1285_v59  ;;  %vm1308_vm13 = vcmp.eq.f32.partialorder %v1288_v7, inf }
 0x26b   : > { %1995 = vrcp.f32 %v1320_v14  ;;  %vm1310_vm14 = vcmp.eq.f32.partialorder %v1288_v7, 0.0  ;;  %v1311_v30 = vand.u32 2147483648, %v1288_v7  ;;  %vm1315_vm15 = vcmp.eq.f32.partialorder %v1291_v9, inf }
 0x26c   : > { %1997 = vrcp.f32 %v1321_v15  ;;  %v1318_v3 = vand.u32 2147483648, %v1291_v9  ;;  %vm1317_vm1 = vcmp.eq.f32.partialorder %v1291_v9, 0.0 }
 0x26d   : > { %1999 = vrcp.f32 %v1322_v46 }
 0x26e   : > { %2001 = vrcp.f32 %v1323_v24 }
 0x271   : > { %v1988_v22 = vpop.eup %1987 }
 0x272   : > { %v1990_v53 = vpop.eup %1989  ;;  %v1293_v26 = vmul.f32 %v1988_v22, %v1282_v58 }
 0x273   : > { %v1992_v4 = vpop.eup %1991  ;;  %v1300_v29 = vmul.f32 %v1990_v53, %v1285_v59 }
 0x274   : > { %v1994_v11 = vpop.eup %1993  ;;  %v1295_v13 = vsel %vm1294_vm9, %v1282_v58, %v1293_v26  ;;  %v1307_v17 = vmul.f32 %v1992_v4, %v1288_v7 }
 0x275   : > { %v1298_v27 = vsel %vm1296_vm10, %v1297_v47, %v1295_v13  ;;  %v1302_v40 = vsel %vm1301_vm11, %v1285_v59, %v1300_v29  ;;  %v1314_v12 = vmul.f32 %v1994_v11, %v1291_v9  ;;  %v1996_v31 = vpop.eup %1995 }
 0x276   : > { %v1305_v28 = vsel %vm1303_vm12, %v1304_v39, %v1302_v40  ;;  %v1309_v32 = vsel %vm1308_vm13, %v1288_v7, %v1307_v17  ;;  %v1998_v52 = vpop.eup %1997  ;;  %v1328_v57 = vmul.f32 %v1996_v31, %v1298_v27 }
 0x277   : > { %v1312_v55 = vsel %vm1310_vm14, %v1311_v30, %v1309_v32  ;;  %v1316_v56 = vsel %vm1315_vm15, %v1291_v9, %v1314_v12  ;;  %v2000_v14 = vpop.eup %1999  ;;  %v1329_v58 = vmul.f32 %v1998_v52, %v1305_v28 }
 0x278   : > { %v1319_v45 = vsel %vm1317_vm1, %v1318_v3, %v1316_v56  ;;  %v2002_v15 = vpop.eup %2001  ;;  %v1330_v46 = vmul.f32 %v2000_v14, %v1312_v55  ;;  %v1332_v24 = vmul.f32 %v1328_v57, %v2456_v2  ;;  %v1333_v59 = vmul.f32 %v1328_v57, %v2458_v38 }
 0x279   : > { %v1331_v22 = vmul.f32 %v2002_v15, %v1319_v45  ;;  %v1336_v7 = vmul.f32 %v1329_v58, %v2475_v34  ;;  %v1334_v53 = vmul.f32 %v1328_v57, %v2467_v33  ;;  %v1335_v26 = vmul.f32 %v1328_v57, %v2484_v16 }
 0x27a   : > { %v1337_v9 = vmul.f32 %v1329_v58, %v2477_v35  ;;  %v1340_v47 = vmul.f32 %v1330_v46, %v2479_v6  ;;  %v1338_v4 = vmul.f32 %v1329_v58, %v2487_v18  ;;  %v1339_v29 = vmul.f32 %v1329_v58, %v2500_v23 }
 0x27b   : > { %v1341_v39 = vmul.f32 %v1330_v46, %v2481_v8  ;;  %v1342_v2 = vmul.f32 %v1330_v46, %v2489_v21  ;;  %v1344_v38 = vmul.f32 %v1331_v22, %v2491_v5  ;;  %v1345_v34 = vmul.f32 %v1331_v22, %v2493_v25 }
 0x27c   : > { %v1348_v33 = vmul.f32 %v1332_v24, %v2222_v41  ;;  %v1349_v16 = vmul.f32 %v1333_v59, %v2224_v42  ;;  %v1343_v35 = vmul.f32 %v1330_v46, %v2508_v20  ;;  %v1346_v6 = vmul.f32 %v1331_v22, %v2502_v19 }
 0x27d   : > { %v1347_v18 = vmul.f32 %v1331_v22, %v2516_v10  ;;  %v1352_v23 = vmul.f32 %v1336_v7, %v2238_v60  ;;  %v1350_v8 = vmul.f32 %v1334_v53, %v2226_v43  ;;  %v1351_v21 = vmul.f32 %v1335_v26, %v2228_v44 }
 0x27e   : > { %v1353_v5 = vmul.f32 %v1337_v9, %v2240_v61  ;;  %v1356_v25 = vmul.f32 %v1340_v47, %v2242_v62  ;;  %v1354_v11 = vmul.f32 %v1338_v4, %v2246_v0  ;;  %v1355_v13 = vmul.f32 %v1339_v29, %v2248_v1 }
 0x27f   : > { %v1357_v20 = vmul.f32 %v1341_v39, %v2244_v63  ;;  %v1358_v19 = vmul.f32 %v1342_v2, %v2258_v36  ;;  %v1360_v10 = vmul.f32 %v1344_v38, %v2262_v48  ;;  %v1361_v17 = vmul.f32 %v1345_v34, %v2264_v49 }
 0x280   : > { %v1364_v27 = vsel %vm848_vm0, %v1348_v33, 0.0  ;;  %v1365_v40 = vsel %vm848_vm0, %v1349_v16, 0.0  ;;  %v1359_v30 = vmul.f32 %v1343_v35, %v2260_v37  ;;  %v1362_v12 = vmul.f32 %v1346_v6, %v2266_v50  ;;  %v2793_v16 = vld [vmem:[#allocation4_spill] sm:$0xff] }
 0x281   : > { %v1366_v28 = vadd.f32 %v1365_v40, %v1364_v27  ;;  %v1371_v32 = vsel %vm848_vm0, %v1352_v23, 0.0  ;;  %v1363_v3 = vmul.f32 %v1347_v18, %v2268_v51  ;;  %v1367_v31 = vsel %vm848_vm0, %v1350_v8, 0.0  ;;  %v2794_v18 = vld [vmem:[#allocation5_spill] sm:$0xff]  ;;  %v2795_v8 = vld [vmem:[#allocation6_spill] sm:$0xff] }
 0x282   : > { %v1372_v55 = vsel %vm848_vm0, %v1353_v5, 0.0  ;;  %v1378_v56 = vsel %vm848_vm0, %v1356_v25, 0.0  ;;  %v1369_v45 = vsel %vm848_vm0, %v1351_v21, 0.0  ;;  %v1379_v14 = vsel %vm848_vm0, %v1357_v20, 0.0 }
 0x283   : > { %v1368_v52 = vadd.f32 %v1367_v31, %v1366_v28  ;;  %v1373_v57 = vadd.f32 %v1372_v55, %v1371_v32  ;;  %v1374_v58 = vsel %vm848_vm0, %v1354_v11, 0.0  ;;  %v1380_v15 = vadd.f32 %v1379_v14, %v1378_v56 }
 0x284   : > { %v1385_v46 = vsel %vm848_vm0, %v1360_v10, 0.0  ;;  %v1386_v24 = vsel %vm848_vm0, %v1361_v17, 0.0  ;;  %v1381_v7 = vsel %vm848_vm0, %v1358_v19, 0.0  ;;  %v1376_v26 = vsel %vm848_vm0, %v1355_v13, 0.0 }
 0x285   : > { %v1370_v59 = vadd.f32 %v1369_v45, %v1368_v52  ;;  %v1375_v22 = vadd.f32 %v1374_v58, %v1373_v57  ;;  %v1387_v53 = vadd.f32 %v1386_v24, %v1385_v46  ;;  %v1382_v9 = vadd.f32 %v1381_v7, %v1380_v15 }
 0x286   : > { %v1388_v47 = vsel %vm848_vm0, %v1362_v12, 0.0  ;;  %v1383_v29 = vsel %vm848_vm0, %v1359_v30, 0.0  ;;  %v1390_v34 = vsel %vm848_vm0, %v1363_v3, 0.0 }
 0x287   : > { %v1377_v4 = vadd.f32 %v1376_v26, %v1375_v22  ;;  %v1389_v39 = vadd.f32 %v1388_v47, %v1387_v53  ;;  %v1392_v2 = vadd.f32 %v1370_v59, %v2402_v54  ;;  %v1384_v38 = vadd.f32 %v1383_v29, %v1382_v9 }
 0x289   : > { %v1391_v33 = vadd.f32 %v1390_v34, %v1389_v39  ;;  %v1393_v35 = vadd.f32 %v1377_v4, %v2793_v16  ;;  %v1396_v6 = vsel %vm848_vm0, %v1392_v2, -inf  ;;  %v1394_v23 = vadd.f32 %v1384_v38, %v2794_v18 }
 0x28b   : > { %v1395_v21 = vadd.f32 %v1391_v33, %v2795_v8  ;;  %v1397_v5 = vsel %vm848_vm0, %v1393_v35, -inf  ;;  %v1398_v25 = vsel %vm848_vm0, %v1394_v23, -inf }
 0x28c   : > { %v1400_v11 = vmax.f32 %v1396_v6, %v1397_v5 }
 0x28d   : > { %v1399_v13 = vsel %vm848_vm0, %v1395_v21, -inf }
 0x28e   : > { %v1401_v54 = vmax.f32 %v1398_v25, %v1399_v13 }
 0x290   : > { %v1402_v20 = vmax.f32 %v1400_v11, %v1401_v54 }
 0x292   : > { %v1403_v19 = vsub.f32 %v1392_v2, %v1402_v20  ;;  %v1404_v10 = vsub.f32 %v1393_v35, %v1402_v20  ;;  %v1405_v17 = vsub.f32 %v1394_v23, %v1402_v20  ;;  %v1406_v27 = vsub.f32 %v1395_v21, %v1402_v20 }
 0x294   : > { %v1407_v40 = vmul.f32 1.442695, %v1403_v19  ;;  %v1409_v30 = vmul.f32 1.442695, %v1404_v10  ;;  %v1411_v12 = vmul.f32 1.442695, %v1405_v17 }
 0x295   : > { %v1413_v28 = vmul.f32 1.442695, %v1406_v27 }
 0x296   : > { %2003 = vpow2.f32 %v1407_v40 }
 0x297   : > { %2005 = vpow2.f32 %v1409_v30 }
 0x298   : > { %2007 = vpow2.f32 %v1411_v12 }
 0x299   : > { %2009 = vpow2.f32 %v1413_v28 }
 0x2a0   : > { %v2004_v32 = vpop.eup %2003 }
 0x2a1   : > { %v2006_v3 = vpop.eup %2005  ;;  %v1415_v31 = vsel %vm848_vm0, %v2004_v32, 0.0 }
 0x2a2   : > { %v2008_v55 = vpop.eup %2007  ;;  %v1416_v56 = vsel %vm848_vm0, %v2006_v3, 0.0 }
 0x2a3   : > { %v2010_v52 = vpop.eup %2009  ;;  %v1417_v45 = vadd.f32 %v1416_v56, %v1415_v31  ;;  %v1418_v57 = vsel %vm848_vm0, %v2008_v55, 0.0 }
 0x2a4   : > { %v1420_v58 = vsel %vm848_vm0, %v2010_v52, 0.0 }
 0x2a5   : > { %v1419_v14 = vadd.f32 %v1418_v57, %v1417_v45 }
 0x2a7   : > { %v1421_v15 = vadd.f32 %v1420_v58, %v1419_v14 }
 0x2a9   : > { %2011 = vrcp.f32 %v1421_v15 }
 0x2b3   : > { %v2012_v46 = vpop.eup %2011 }
 0x2b4   : > { %v1423_v24 = vmul.f32 %v2012_v46, %v2004_v32  ;;  %v1424_v59 = vmul.f32 %v2012_v46, %v2006_v3  ;;  %v1425_v22 = vmul.f32 %v2012_v46, %v2008_v55  ;;  %v1426_v2 = vmul.f32 %v2012_v46, %v2010_v52 }
 0x2b6   : > { %v1427_v7 = vmul.f32 %v1423_v24, %v2222_v41  ;;  %v1428_v53 = vmul.f32 %v1423_v24, %v2224_v42  ;;  %v1429_v26 = vmul.f32 %v1423_v24, %v2226_v43  ;;  %v1430_v9 = vmul.f32 %v1423_v24, %v2228_v44 }
 0x2b7   : > { %v1431_v47 = vmul.f32 %v1424_v59, %v2238_v60  ;;  %v1432_v4 = vmul.f32 %v1424_v59, %v2240_v61  ;;  %v1433_v29 = vmul.f32 %v1424_v59, %v2246_v0  ;;  %v1434_v39 = vmul.f32 %v1424_v59, %v2248_v1 }
 0x2b8   : > { %v1435_v38 = vmul.f32 %v1425_v22, %v2242_v62  ;;  %v1436_v34 = vmul.f32 %v1425_v22, %v2244_v63  ;;  %v1443_v41 = vsel %vm848_vm0, %v1427_v7, 0.0  ;;  %v1450_v42 = vsel %vm848_vm0, %v1428_v53, 0.0 }
 0x2b9   : > { %v1457_v43 = vsel %vm848_vm0, %v1429_v26, 0.0  ;;  %v1464_v44 = vsel %vm848_vm0, %v1430_v9, 0.0  ;;  %v1444_v60 = vrot.slane %v1443_v41, 4  ;;  %v1451_v33 = vrot.slane %v1450_v42, 4 }
 0x2ba   : > { %v1458_v61 = vrot.slane %v1457_v43, 4  ;;  %v1465_v16 = vrot.slane %v1464_v44, 4  ;;  %v1471_v0 = vsel %vm848_vm0, %v1431_v47, 0.0  ;;  %v1478_v1 = vsel %vm848_vm0, %v1432_v4, 0.0 }
 0x2bb   : > { %v1485_v62 = vsel %vm848_vm0, %v1433_v29, 0.0  ;;  %v1492_v63 = vsel %vm848_vm0, %v1434_v39, 0.0  ;;  %v1445_v35 = vadd.f32 %v1444_v60, %v1443_v41  ;;  %v1452_v6 = vadd.f32 %v1451_v33, %v1450_v42 }
 0x2bc   : > { %v1459_v18 = vadd.f32 %v1458_v61, %v1457_v43  ;;  %v1466_v23 = vadd.f32 %v1465_v16, %v1464_v44  ;;  %v1472_v8 = vrot.slane %v1471_v0, 4  ;;  %v1479_v21 = vrot.slane %v1478_v1, 4 }
 0x2bd   : > { %v1486_v5 = vrot.slane %v1485_v62, 4  ;;  %v1493_v25 = vrot.slane %v1492_v63, 4  ;;  %v1446_v11 = vrot.slane %v1445_v35, 2  ;;  %v1453_v13 = vrot.slane %v1452_v6, 2 }
 0x2be   : > { %v1460_v54 = vrot.slane %v1459_v18, 2  ;;  %v1467_v20 = vrot.slane %v1466_v23, 2  ;;  %v1473_v19 = vadd.f32 %v1472_v8, %v1471_v0  ;;  %v1480_v10 = vadd.f32 %v1479_v21, %v1478_v1 }
 0x2bf   : > { %v1487_v17 = vadd.f32 %v1486_v5, %v1485_v62  ;;  %v1494_v27 = vadd.f32 %v1493_v25, %v1492_v63  ;;  %v1447_v40 = vadd.f32 %v1446_v11, %v1445_v35  ;;  %v1454_v30 = vadd.f32 %v1453_v13, %v1452_v6 }
 0x2c0   : > { %v1461_v12 = vadd.f32 %v1460_v54, %v1459_v18  ;;  %v2614_v28 = vadd.f32 %v1467_v20, %v1466_v23  ;;  %v1474_v32 = vrot.slane %v1473_v19, 2  ;;  %v1481_v3 = vrot.slane %v1480_v10, 2 }
 0x2c1   : > { %v1488_v31 = vrot.slane %v1487_v17, 2  ;;  %v1495_v55 = vrot.slane %v1494_v27, 2  ;;  %v1437_v56 = vmul.f32 %v1425_v22, %v2258_v36  ;;  %v1438_v52 = vmul.f32 %v1425_v22, %v2260_v37 }
 0x2c2   : > { %v1448_v45 = vrot.slane %v1447_v40, 1  ;;  %v1455_v57 = vrot.slane %v1454_v30, 1  ;;  %v1462_v14 = vrot.slane %v1461_v12, 1  ;;  %v1475_v58 = vadd.f32 %v1474_v32, %v1473_v19 }
 0x2c3   : > { %v1482_v15 = vadd.f32 %v1481_v3, %v1480_v10  ;;  %v2618_v46 = vadd.f32 %v1488_v31, %v1487_v17  ;;  %v1439_v24 = vmul.f32 %v1426_v2, %v2262_v48  ;;  %v1440_v59 = vmul.f32 %v1426_v2, %v2264_v49 }
 0x2c4   : > { %v1441_v7 = vmul.f32 %v1426_v2, %v2266_v50  ;;  %v1442_v53 = vmul.f32 %v1426_v2, %v2268_v51  ;;  %v2624_v26 = vadd.f32 %v1448_v45, %v1447_v40  ;;  %v2626_v36 = vadd.f32 %v1455_v57, %v1454_v30 }
 0x2c5   : > { %v1469_v37 = vrot.slane %v2614_v28, 1  ;;  %v2629_v22 = vadd.f32 %v1495_v55, %v1494_v27  ;;  %v1499_v9 = vsel %vm848_vm0, %v1435_v38, 0.0  ;;  %v1506_v47 = vsel %vm848_vm0, %v1436_v34, 0.0 }
 0x2c6   : > { %v1513_v48 = vsel %vm848_vm0, %v1437_v56, 0.0  ;;  %v1520_v49 = vsel %vm848_vm0, %v1438_v52, 0.0  ;;  %v2635_v4 = vadd.f32 %v1462_v14, %v1461_v12  ;;  %v1476_v50 = vrot.slane %v1475_v58, 1 }
 0x2c7   : > { %v1483_v51 = vrot.slane %v1482_v15, 1  ;;  %v1490_v29 = vrot.slane %v2618_v46, 1  ;;  %v1500_v39 = vrot.slane %v1499_v9, 4  ;;  %v1507_v2 = vrot.slane %v1506_v47, 4 }
 0x2c8   : > { %v1514_v41 = vrot.slane %v1513_v48, 4  ;;  %v1521_v42 = vrot.slane %v1520_v49, 4  ;;  %v1527_v43 = vsel %vm848_vm0, %v1439_v24, 0.0  ;;  %v1534_v38 = vsel %vm848_vm0, %v1440_v59, 0.0 }
 0x2c9   : > { %v1541_v34 = vsel %vm848_vm0, %v1441_v7, 0.0  ;;  %v1548_v44 = vsel %vm848_vm0, %v1442_v53, 0.0  ;;  %v1501_v60 = vadd.f32 %v1500_v39, %v1499_v9  ;;  %v1508_v33 = vadd.f32 %v1507_v2, %v1506_v47 }
 0x2ca   : > { %v1515_v61 = vadd.f32 %v1514_v41, %v1513_v48  ;;  %v1522_v16 = vadd.f32 %v1521_v42, %v1520_v49  ;;  %v1528_v0 = vrot.slane %v1527_v43, 4  ;;  %v1535_v1 = vrot.slane %v1534_v38, 4 }
 0x2cb   : > { %v1542_v62 = vrot.slane %v1541_v34, 4  ;;  %v1549_v63 = vrot.slane %v1548_v44, 4  ;;  %v1502_v35 = vrot.slane %v1501_v60, 2  ;;  %v1509_v6 = vrot.slane %v1508_v33, 2 }
 0x2cc   : > { %v1516_v18 = vrot.slane %v1515_v61, 2  ;;  %v1523_v23 = vrot.slane %v1522_v16, 2  ;;  %v1529_v8 = vadd.f32 %v1528_v0, %v1527_v43  ;;  %v1536_v21 = vadd.f32 %v1535_v1, %v1534_v38 }
 0x2cd   : > { %v1543_v5 = vadd.f32 %v1542_v62, %v1541_v34  ;;  %v1550_v25 = vadd.f32 %v1549_v63, %v1548_v44  ;;  %v1503_v11 = vadd.f32 %v1502_v35, %v1501_v60  ;;  %v1510_v13 = vadd.f32 %v1509_v6, %v1508_v33 }
 0x2ce   : > { %v1517_v54 = vadd.f32 %v1516_v18, %v1515_v61  ;;  %v1524_v20 = vadd.f32 %v1523_v23, %v1522_v16  ;;  %v1530_v19 = vrot.slane %v1529_v8, 2  ;;  %v1537_v10 = vrot.slane %v1536_v21, 2 }
 0x2cf   : > { %v1544_v17 = vrot.slane %v1543_v5, 2  ;;  %v1551_v27 = vrot.slane %v1550_v25, 2  ;;  %v1497_v40 = vrot.slane %v2629_v22, 1  ;;  %v1504_v30 = vrot.slane %v1503_v11, 1 }
 0x2d0   : > { %v1511_v12 = vrot.slane %v1510_v13, 1  ;;  %v1518_v32 = vrot.slane %v1517_v54, 1  ;;  %v1531_v3 = vadd.f32 %v1530_v19, %v1529_v8  ;;  %v1538_v31 = vadd.f32 %v1537_v10, %v1536_v21 }
 0x2d1   : > { %v1545_v55 = vadd.f32 %v1544_v17, %v1543_v5  ;;  %v1552_v56 = vadd.f32 %v1551_v27, %v1550_v25  ;;  %v2643_v52 = vadd.f32 %v1476_v50, %v1475_v58  ;;  %v2645_v45 = vadd.f32 %v1483_v51, %v1482_v15 }
 0x2d2   : > { %v2647_v57 = vadd.f32 %v1504_v30, %v1503_v11  ;;  %v1525_v14 = vrot.slane %v1524_v20, 1  ;;  %v2649_v24 = vadd.f32 %v1511_v12, %v1510_v13  ;;  %v1532_v59 = vrot.slane %v1531_v3, 1 }
 0x2d3   : > { %v1539_v7 = vrot.slane %v1538_v31, 1  ;;  %v1546_v53 = vrot.slane %v1545_v55, 1  ;;  %v2652_v9 = vadd.f32 %v1469_v37, %v2614_v28  ;;  %v2655_v47 = vadd.f32 %v1490_v29, %v2618_v46 }
 0x2d4   : > { %v2657_v48 = vadd.f32 %v1518_v32, %v1517_v54  ;;  %v1553_v58 = vrot.slane %v1552_v56, 1  ;;  %v2659_v49 = vadd.f32 %v1532_v59, %v1531_v3  ;;  %v1555_v50 = vmul.f32 %v2624_v26, %v2624_v26 }
 0x2d5   : > { %v2661_v15 = vadd.f32 %v1539_v7, %v1538_v31  ;;  %v1556_v51 = vmul.f32 %v2626_v36, %v2626_v36  ;;  %v2668_v39 = vadd.f32 %v1497_v40, %v2629_v22  ;;  %v2670_v28 = vadd.f32 %v1546_v53, %v1545_v55 }
 0x2d6   : > { %v1559_v46 = vmul.f32 %v2643_v52, %v2643_v52  ;;  %v1560_v37 = vmul.f32 %v2645_v45, %v2645_v45  ;;  %v2676_v29 = vadd.f32 %v1525_v14, %v1524_v20  ;;  %v1557_v2 = vmul.f32 %v2635_v4, %v2635_v4 }
 0x2d7   : > { %v1563_v41 = vmul.f32 %v2647_v57, %v2647_v57  ;;  %v1564_v22 = vmul.f32 %v2649_v24, %v2649_v24  ;;  %v2684_v42 = vadd.f32 %v1553_v58, %v1552_v56  ;;  %v1561_v43 = vmul.f32 %v2655_v47, %v2655_v47 }
 0x2d8   : > { %v1567_v38 = vmul.f32 %v2659_v49, %v2659_v49  ;;  %v1568_v34 = vmul.f32 %v2661_v15, %v2661_v15  ;;  %v1565_v44 = vmul.f32 %v2657_v48, %v2657_v48  ;;  %v1571_v60 = vadd.f32 %v1556_v51, %v1555_v50 }
 0x2d9   : > { %v1574_v33 = vadd.f32 %v1560_v37, %v1559_v46  ;;  %v1577_v61 = vadd.f32 %v1564_v22, %v1563_v41  ;;  %v1558_v16 = vmul.f32 %v2652_v9, %v2652_v9  ;;  %v1562_v0 = vmul.f32 %v2668_v39, %v2668_v39 }
 0x2da   : > { %v1569_v1 = vmul.f32 %v2670_v28, %v2670_v28  ;;  %v1580_v62 = vadd.f32 %v1568_v34, %v1567_v38  ;;  %v1566_v63 = vmul.f32 %v2676_v29, %v2676_v29  ;;  %v1572_v35 = vadd.f32 %v1571_v60, %v1557_v2 }
 0x2db   : > { %v1575_v6 = vadd.f32 %v1574_v33, %v1561_v43  ;;  %v1578_v18 = vadd.f32 %v1577_v61, %v1565_v44  ;;  %v1570_v23 = vmul.f32 %v2684_v42, %v2684_v42 }
 0x2dc   : > { %v1581_v8 = vadd.f32 %v1580_v62, %v1569_v1  ;;  %v1573_v21 = vadd.f32 %v1572_v35, %v1558_v16 }
 0x2dd   : > { %v1576_v5 = vadd.f32 %v1575_v6, %v1562_v0  ;;  %v1579_v25 = vadd.f32 %v1578_v18, %v1566_v63 }
 0x2de   : > { %v1582_v11 = vadd.f32 %v1581_v8, %v1570_v23  ;;  %2013 = vrsqrt.f32 %v1573_v21  ;;  %v1611_v13 = vadd.f32 1.0, %v1573_v21  ;;  %vm1585_vm0 = vcmp.eq.f32.partialorder %v1573_v21, inf }
 0x2df   : > { %2015 = vrsqrt.f32 %v1576_v5  ;;  %v1612_v54 = vadd.f32 1.0, %v1576_v5  ;;  %v1613_v20 = vadd.f32 1.0, %v1579_v25  ;;  %vm1587_vm2 = vcmp.eq.f32.partialorder %v1573_v21, 0.0 }
 0x2e0   : > { %2017 = vrsqrt.f32 %v1579_v25  ;;  %v1614_v19 = vadd.f32 1.0, %v1582_v11  ;;  %v1588_v40 = vand.u32 2147483648, %v1573_v21  ;;  %vm1592_vm3 = vcmp.eq.f32.partialorder %v1576_v5, inf }
 0x2e1   : > { %2019 = vrsqrt.f32 %v1582_v11  ;;  %vm1594_vm4 = vcmp.eq.f32.partialorder %v1576_v5, 0.0  ;;  %v1595_v32 = vand.u32 2147483648, %v1576_v5  ;;  %vm1599_vm5 = vcmp.eq.f32.partialorder %v1579_v25, inf }
 0x2e2   : > { %2021 = vrcp.f32 %v1611_v13  ;;  %vm1601_vm6 = vcmp.eq.f32.partialorder %v1579_v25, 0.0  ;;  %v1602_v59 = vand.u32 2147483648, %v1579_v25  ;;  %vm1606_vm7 = vcmp.eq.f32.partialorder %v1582_v11, inf }
 0x2e3   : > { %2023 = vrcp.f32 %v1612_v54  ;;  %v1609_v50 = vand.u32 2147483648, %v1582_v11  ;;  %vm1608_vm8 = vcmp.eq.f32.partialorder %v1582_v11, 0.0 }
 0x2e4   : > { %2025 = vrcp.f32 %v1613_v20 }
 0x2e5   : > { %2027 = vrcp.f32 %v1614_v19 }
 0x2e8   : > { %v2014_v10 = vpop.eup %2013 }
 0x2e9   : > { %v2016_v17 = vpop.eup %2015  ;;  %v1584_v27 = vmul.f32 %v2014_v10, %v1573_v21 }
 0x2ea   : > { %v2018_v30 = vpop.eup %2017  ;;  %v1591_v12 = vmul.f32 %v2016_v17, %v1576_v5 }
 0x2eb   : > { %v2020_v3 = vpop.eup %2019  ;;  %v1586_v31 = vsel %vm1585_vm0, %v1573_v21, %v1584_v27  ;;  %v1598_v55 = vmul.f32 %v2018_v30, %v1579_v25 }
 0x2ec   : > { %v1589_v56 = vsel %vm1587_vm2, %v1588_v40, %v1586_v31  ;;  %v1593_v14 = vsel %vm1592_vm3, %v1576_v5, %v1591_v12  ;;  %v1605_v7 = vmul.f32 %v2020_v3, %v1582_v11  ;;  %v2022_v51 = vpop.eup %2021 }
 0x2ed   : > { %v1596_v53 = vsel %vm1594_vm4, %v1595_v32, %v1593_v14  ;;  %v1600_v58 = vsel %vm1599_vm5, %v1579_v25, %v1598_v55  ;;  %v2024_v2 = vpop.eup %2023  ;;  %v1619_v22 = vmul.f32 %v2022_v51, %v1589_v56 }
 0x2ee   : > { %v1603_v46 = vsel %vm1601_vm6, %v1602_v59, %v1600_v58  ;;  %v1607_v37 = vsel %vm1606_vm7, %v1582_v11, %v1605_v7  ;;  %v2026_v43 = vpop.eup %2025  ;;  %v1620_v38 = vmul.f32 %v2024_v2, %v1596_v53 }
 0x2ef   : > { %v1610_v41 = vsel %vm1608_vm8, %v1609_v50, %v1607_v37  ;;  %v2028_v34 = vpop.eup %2027  ;;  %v1621_v44 = vmul.f32 %v2026_v43, %v1603_v46  ;;  %v1623_v60 = vmul.f32 %v1619_v22, %v2624_v26  ;;  %v1624_v33 = vmul.f32 %v1619_v22, %v2626_v36 }
 0x2f0   : > { %v1625_v61 = vmul.f32 %v1619_v22, %v2635_v4  ;;  %v1622_v16 = vmul.f32 %v2028_v34, %v1610_v41  ;;  %v1626_v0 = vmul.f32 %v1619_v22, %v2652_v9  ;;  %v1627_v1 = vmul.f32 %v1620_v38, %v2643_v52 }
 0x2f1   : > { %v1628_v62 = vmul.f32 %v1620_v38, %v2645_v45  ;;  %v1629_v63 = vmul.f32 %v1620_v38, %v2655_v47  ;;  %v1630_v35 = vmul.f32 %v1620_v38, %v2668_v39  ;;  %v1631_v6 = vmul.f32 %v1621_v44, %v2647_v57  ;;  %1639 = vst [vmem:[%s2786_s3] sm:$0x1] %v1623_v60 }
 0x2f2   : > { %v1632_v18 = vmul.f32 %v1621_v44, %v2649_v24  ;;  %1640 = vst [vmem:[%s2786_s3 + $0x1] sm:$0x1] %v1624_v33  ;;  %1641 = vst [vmem:[%s2786_s3 + $0x2] sm:$0x1] %v1625_v61  ;;  %v1633_v26 = vmul.f32 %v1621_v44, %v2657_v48  ;;  %v1634_v36 = vmul.f32 %v1621_v44, %v2676_v29 }
 0x2f3   : > { %v1635_v4 = vmul.f32 %v1622_v16, %v2659_v49  ;;  %v1636_v52 = vmul.f32 %v1622_v16, %v2661_v15  ;;  %1642 = vst [vmem:[%s2786_s3 + $0x3] sm:$0x1] %v1626_v0  ;;  %1643 = vst [vmem:[%s2786_s3 + $0x4] sm:$0x1] %v1627_v1  ;;  %v1637_v45 = vmul.f32 %v1622_v16, %v2670_v28 }
 0x2f4   : > { %1644 = vst [vmem:[%s2786_s3 + $0x5] sm:$0x1] %v1628_v62  ;;  %v1638_v57 = vmul.f32 %v1622_v16, %v2684_v42  ;;  %1645 = vst [vmem:[%s2786_s3 + $0x6] sm:$0x1] %v1629_v63 }
 0x2f5   : > { %1646 = vst [vmem:[%s2786_s3 + $0x7] sm:$0x1] %v1630_v35  ;;  %1647 = vst [vmem:[%s2786_s3 + $0x8] sm:$0x1] %v1631_v6 }
 0x2f6   : > { %1648 = vst [vmem:[%s2786_s3 + $0x9] sm:$0x1] %v1632_v18  ;;  %1649 = vst [vmem:[%s2786_s3 + $0xa] sm:$0x1] %v1633_v26 }
 0x2f7   : > { %1650 = vst [vmem:[%s2786_s3 + $0xb] sm:$0x1] %v1634_v36  ;;  %1651 = vst [vmem:[%s2786_s3 + $0xc] sm:$0x1] %v1635_v4 }
 0x2f8   : > { %1652 = vst [vmem:[%s2786_s3 + $0xd] sm:$0x1] %v1636_v52  ;;  %1653 = vst [vmem:[%s2786_s3 + $0xe] sm:$0x1] %v1637_v45 }
 0x2f9   : > { %1654 = vst [vmem:[%s2786_s3 + $0xf] sm:$0x1] %v1638_v57 }
 0x2fa PF: > { %s13_s16 = sadd.s32 1, %s2067_s16   ;;  %s2796_s12 = smov %s2055_s13 }
 0x2fb   : > { %p10_p12 = scmp.ge.s32.totalorder %s13_s16, 4   ;;  %s2797_s13 = smov %s2126_s20 }
 0x2fc   : > { %s2798_s14 = smov %s2063_s15  ;;  %s2799_s15 = smov %s2801_s17 }
 0x2fd   :  { %12 = sbr.rel (!%p10_p12) target bundleno = 3 (0x3), region = 116 }

</bundles_post_ra>
